<compile_context>
chip_gen: v7x
topology: tpu7x:2x2x1
jax: 0.10.0
libtpu: 0.0.40
codegen_flags: <defaults>
</compile_context>

<pallas_src>
import functools

import jax
import jax.numpy as jnp
import numpy as np
from jax.experimental import pallas as pl
from jax.experimental.pallas import tpu as pltpu

EPS = 1e-5
VMEM_BUDGET = 12 * 1024 * 1024   # pass-1 working-set budget (fits v5e 16 MiB default)
VMEM_LIMIT = 32 * 1024 * 1024    # <= physical VMEM on v5e/v6e (128 MiB) and v7x (64 MiB)


def _round_up(x, m):
    return (x + m - 1) // m * m


# ----------------------------------------------------------------------------
# Pallas kernels
# ----------------------------------------------------------------------------
def _matmul_stats_kernel(p_ref, w_ref, y_ref, sum_ref, sq_ref):
    """Pass 1: tiled im2col matmul (bf16 operands, f32 accumulation) + global
    per-channel sum / sum-of-squares for training-mode BN.  The (1, C)
    accumulators are revisited every step -> grid axis must be "arbitrary"."""
    y = jnp.dot(p_ref[...], w_ref[...], preferred_element_type=jnp.float32)
    y_ref[...] = y

    @pl.when(pl.program_id(0) == 0)
    def _init():
        sum_ref[...] = jnp.zeros_like(sum_ref)
        sq_ref[...] = jnp.zeros_like(sq_ref)

    # Kept on the VPU (exact f32 adds).  Routing the reduce through the MXU
    # (ones-vector matmul) would need precision=HIGHEST f32 matmuls to keep the
    # batch statistics exact; only worthwhile for the narrow-K early layers.
    sum_ref[...] += jnp.sum(y, axis=0, keepdims=True)
    sq_ref[...] += jnp.sum(y * y, axis=0, keepdims=True)


def _bn_coeffs(sum_ref, sq_ref, g_ref, b_ref, inv_m):
    mean = sum_ref[...] * inv_m
    # One-pass variance (E[y^2]-E[y]^2) in f32 with a clamp (biased, eps=1e-5).
    var = jnp.maximum(sq_ref[...] * inv_m - mean * mean, 0.0)
    scale = jax.lax.rsqrt(var + EPS) * g_ref[...]
    shift = b_ref[...] - mean * scale
    return scale, shift


def _bn_relu_kernel(y_ref, sum_ref, sq_ref, g_ref, b_ref, o_ref, *, inv_m):
    """Pass 2 (conv1, identity-shortcut path): BN + ReLU, stored as bf16."""
    scale, shift = _bn_coeffs(sum_ref, sq_ref, g_ref, b_ref, inv_m)
    o_ref[...] = jnp.maximum(y_ref[...] * scale + shift, 0.0).astype(o_ref.dtype)


def _bn_split_kernel(y_ref, sum_ref, sq_ref, g_ref, b_ref, y1_ref, sc_ref, *,
                     inv_m, cp):
    """Pass 2 (fused conv1 + projection shortcut): lanes [0, cp) are conv1
    (BN + ReLU -> bf16), lanes [cp, 2*cp) are the shortcut (BN only -> f32)."""
    scale, shift = _bn_coeffs(sum_ref, sq_ref, g_ref, b_ref, inv_m)
    o = y_ref[...] * scale + shift                     # (tile_m, 2*cp) f32
    y1_ref[...] = jnp.maximum(o[:, :cp], 0.0).astype(y1_ref.dtype)
    sc_ref[...] = o[:, cp:]


def _bn_add_relu_kernel(y_ref, sum_ref, sq_ref, g_ref, b_ref, sc_ref, o_ref, *,
                        inv_m):
    """Pass 2 (block epilogue): BN + residual add + final ReLU."""
    scale, shift = _bn_coeffs(sum_ref, sq_ref, g_ref, b_ref, inv_m)
    o_ref[...] = jnp.maximum(y_ref[...] * scale + shift + sc_ref[...], 0.0)


# ----------------------------------------------------------------------------
# JAX-level layout helpers
# ----------------------------------------------------------------------------
def _im2col(x_nhwc, stride):
    """(N,H,W,C) -> (N*Ho*Wo, 9*C) patches, (kh, kw, cin) fastest, matching the
    (2,3,1,0)-transposed weight layout.  Keeps the input dtype (pass bf16)."""
    n, h, w, c = x_nhwc.shape
    xp = jnp.pad(x_nhwc, ((0, 0), (1, 1), (1, 1), (0, 0)))
    ho = (h + 2 - 3) // stride + 1
    wo = (w + 2 - 3) // stride + 1
    cols = []
    for kh in range(3):
        for kw in range(3):
            cols.append(xp[:, kh:kh + (ho - 1) * stride + 1:stride,
                              kw:kw + (wo - 1) * stride + 1:stride, :])
    patches = jnp.stack(cols, axis=3)            # (N, Ho, Wo, 9, C)
    return patches.reshape(n * ho * wo, 9 * c)


def _weight_2d(w_oihw, kp, cp):
    """(O,I,3,3) -> bf16 (kp, cp); rows ordered (kh, kw, cin), zero padded."""
    cout, cin = w_oihw.shape[0], w_oihw.shape[1]
    w2d = jnp.transpose(w_oihw, (2, 3, 1, 0)).reshape(9 * cin, cout)
    return jnp.pad(w2d.astype(jnp.bfloat16), ((0, kp - 9 * cin), (0, cp - cout)))


def _vec_pad(v, cp):
    c = v.shape[0]
    return jnp.pad(v.astype(jnp.float32).reshape(1, c), ((0, 0), (0, cp - c)))


def _max_tile_m(kp, ncols, budget=VMEM_BUDGET):
    """Largest M tile keeping pass-1's double-buffered working set under budget:
       2x (tile_m, kp) bf16 LHS + 2x (kp, ncols) bf16 weight
     + 2x (tile_m, ncols) f32 pre-BN output (+ tiny stats blocks).
    TODO(synk): >=512-channel fused layers exceed the budget on the resident
    weight alone and would additionally need K/N tiling."""
    avail = budget - 4 * kp * ncols
    per_row = 4 * kp + 8 * ncols
    return max(64, (avail // per_row) // 16 * 16)


def _matmul_stats(p_pad, w_pad, *, tile_m):
    """Pass-1 pallas_call: matmul + per-channel batch statistics."""
    mp, kp = p_pad.shape
    ncols = w_pad.shape[1]
    return pl.pallas_call(
        _matmul_stats_kernel,
        grid=(mp // tile_m,),
        in_specs=[
            pl.BlockSpec((tile_m, kp), lambda i: (i, 0)),
            pl.BlockSpec((kp, ncols), lambda i: (0, 0)),   # weight resident
        ],
        out_specs=[
            pl.BlockSpec((tile_m, ncols), lambda i: (i, 0)),
            pl.BlockSpec((1, ncols), lambda i: (0, 0)),    # sum accumulator
            pl.BlockSpec((1, ncols), lambda i: (0, 0)),    # sumsq accumulator
        ],
        out_shape=[
            jax.ShapeDtypeStruct((mp, ncols), jnp.float32),
            jax.ShapeDtypeStruct((1, ncols), jnp.float32),
            jax.ShapeDtypeStruct((1, ncols), jnp.float32),
        ],
        compiler_params=pltpu.CompilerParams(
            dimension_semantics=("arbitrary",),
            vmem_limit_bytes=VMEM_LIMIT),
    )(p_pad, w_pad)


# ----------------------------------------------------------------------------
# BasicBlock forward (Pallas)
# ----------------------------------------------------------------------------
def basic_block_forward(x_nchw, params, *, stride, tile_m=512):
    x = jnp.transpose(x_nchw, (0, 2, 3, 1)).astype(jnp.float32)   # NCHW -> NHWC
    n, h, w, in_c = x.shape
    out_c = params["w0"].shape[0]
    ho = (h + 2 - 3) // stride + 1
    wo = (w + 2 - 3) // stride + 1
    m = n * ho * wo
    cp = _round_up(out_c, 128)                   # lane-dense output channels
    has_proj = (stride != 1) or (in_c != out_c)

    k1 = 9 * in_c
    kp1 = _round_up(k1, 128)                     # lane-dense K (review item)
    k2 = 9 * out_c
    kp2 = _round_up(k2, 128)
    ncols1 = 2 * cp if has_proj else cp          # fused conv1+shortcut columns

    # VMEM-budgeted M tile (fits all generations' default scoped VMEM).
    tm = min(tile_m, _max_tile_m(kp1, ncols1), _max_tile_m(kp2, cp),
             _round_up(m, 16))
    tm = max(16, tm // 16 * 16)
    mp = _round_up(m, tm)
    grid_m = mp // tm
    inv_m = 1.0 / float(m)      # stats divide by the real row count (no padding)

    par = pltpu.CompilerParams(dimension_semantics=("parallel",),
                               vmem_limit_bytes=VMEM_LIMIT)
    row2 = pl.BlockSpec((tm, ncols1), lambda i: (i, 0))
    vec2 = pl.BlockSpec((1, ncols1), lambda i: (0, 0))
    row1 = pl.BlockSpec((tm, cp), lambda i: (i, 0))
    vec1 = pl.BlockSpec((1, cp), lambda i: (0, 0))

    # ---- stage A, pass 1: conv1 (and projection shortcut, fused) -----------
    patches = _im2col(x.astype(jnp.bfloat16), stride)    # shared bf16 im2col
    p_pad = jnp.pad(patches, ((0, mp - m), (0, kp1 - k1)))
    w0_pad = _weight_2d(params["w0"], kp1, cp)
    g0, b0 = _vec_pad(params["g0"], cp), _vec_pad(params["b0"], cp)
    if has_proj:
        w_cat = jnp.concatenate([w0_pad, _weight_2d(params["ws"], kp1, cp)], axis=1)
        g_cat = jnp.concatenate([g0, _vec_pad(params["gs"], cp)], axis=1)
        b_cat = jnp.concatenate([b0, _vec_pad(params["bs"], cp)], axis=1)
    else:
        w_cat, g_cat, b_cat = w0_pad, g0, b0
    y_a, sum_a, sq_a = _matmul_stats(p_pad, w_cat, tile_m=tm)

    # ---- stage A, pass 2: BN(+ReLU) -> y1 (bf16); projection shortcut (f32) -
    if has_proj:
        y1_2d, sc_2d = pl.pallas_call(
            functools.partial(_bn_split_kernel, inv_m=inv_m, cp=cp),
            grid=(grid_m,),
            in_specs=[row2, vec2, vec2, vec2, vec2],
            out_specs=[row1, row1],
            out_shape=[jax.ShapeDtypeStruct((mp, cp), jnp.bfloat16),
                       jax.ShapeDtypeStruct((mp, cp), jnp.float32)],
            compiler_params=par,
        )(y_a, sum_a, sq_a, g_cat, b_cat)
    else:
        y1_2d = pl.pallas_call(
            functools.partial(_bn_relu_kernel, inv_m=inv_m),
            grid=(grid_m,),
            in_specs=[row1, vec1, vec1, vec1, vec1],
            out_specs=row1,
            out_shape=jax.ShapeDtypeStruct((mp, cp), jnp.bfloat16),
            compiler_params=par,
        )(y_a, sum_a, sq_a, g_cat, b_cat)
        sc_2d = jnp.pad(x.reshape(m, in_c), ((0, mp - m), (0, cp - in_c)))

    # ---- stage B: conv2 (stride 1) + BN, then + shortcut, final ReLU -------
    y1 = y1_2d[:m, :out_c].reshape(n, ho, wo, out_c)             # bf16 NHWC
    patches2 = _im2col(y1, 1)                                    # (m, 9*out_c)
    p2_pad = jnp.pad(patches2, ((0, mp - m), (0, kp2 - k2)))
    w3_pad = _weight_2d(params["w3"], kp2, cp)
    y_b, sum_b, sq_b = _matmul_stats(p2_pad, w3_pad, tile_m=tm)

    out_2d = pl.pallas_call(
        functools.partial(_bn_add_relu_kernel, inv_m=inv_m),
        grid=(grid_m,),
        in_specs=[row1, vec1, vec1, vec1, vec1, row1],
        out_specs=row1,
        out_shape=jax.ShapeDtypeStruct((mp, cp), jnp.float32),
        compiler_params=par,
    )(y_b, sum_b, sq_b, _vec_pad(params["g3"], cp), _vec_pad(params["b3"], cp),
      sc_2d)

    out = out_2d[:m, :out_c].reshape(n, ho, wo, out_c)
    return jnp.transpose(out, (0, 3, 1, 2))                      # back to NCHW


# ----------------------------------------------------------------------------
# Pure-JAX reference (mirrors the kernel's bf16 matmul operands / f32 BN)
# ----------------------------------------------------------------------------
def _ref_conv_bn(x_nhwc, w_oihw, gamma, beta, stride, relu):
    w = jnp.transpose(w_oihw, (2, 3, 1, 0)).astype(jnp.bfloat16)  # HWIO
    y = jax.lax.conv_general_dilated(
        x_nhwc.astype(jnp.bfloat16), w, window_strides=(stride, stride),
        padding=((1, 1), (1, 1)), dimension_numbers=("NHWC", "HWIO", "NHWC"),
        preferred_element_type=jnp.float32)
    mean = y.mean(axis=(0, 1, 2), keepdims=True)
    var = jnp.square(y - mean).mean(axis=(0, 1, 2), keepdims=True)
    y = (y - mean) * jax.lax.rsqrt(var + EPS) * gamma + beta
    return jnp.maximum(y, 0.0) if relu else y


def _ref_basic_block(x_nchw, params, *, stride):
    x = jnp.transpose(x_nchw, (0, 2, 3, 1)).astype(jnp.float32)
    in_c = x.shape[-1]
    out_c = params["w0"].shape[0]
    y1 = _ref_conv_bn(x, params["w0"], params["g0"], params["b0"], stride, True)
    if stride != 1 or in_c != out_c:
        sc = _ref_conv_bn(x, params["ws"], params["gs"], params["bs"], stride, False)
    else:
        sc = x
    y2 = _ref_conv_bn(y1, params["w3"], params["g3"], params["b3"], 1, False)
    return jnp.transpose(jnp.maximum(y2 + sc, 0.0), (0, 3, 1, 2))


# ----------------------------------------------------------------------------
def _make_params(key, in_c, out_c, with_shortcut):
    ks = jax.random.split(key, 9)
    params = {
        "w0": 0.1 * jax.random.normal(ks[0], (out_c, in_c, 3, 3), jnp.float32),
        "g0": 1.0 + 0.1 * jax.random.normal(ks[1], (out_c,), jnp.float32),
        "b0": 0.1 * jax.random.normal(ks[2], (out_c,), jnp.float32),
        "w3": 0.1 * jax.random.normal(ks[3], (out_c, out_c, 3, 3), jnp.float32),
        "g3": 1.0 + 0.1 * jax.random.normal(ks[4], (out_c,), jnp.float32),
        "b3": 0.1 * jax.random.normal(ks[5], (out_c,), jnp.float32),
    }
    if with_shortcut:
        params.update({
            "ws": 0.1 * jax.random.normal(ks[6], (out_c, in_c, 3, 3), jnp.float32),
            "gs": 1.0 + 0.1 * jax.random.normal(ks[7], (out_c,), jnp.float32),
            "bs": 0.1 * jax.random.normal(ks[8], (out_c,), jnp.float32),
        })
    return params


if __name__ == "__main__":
    key = jax.random.PRNGKey(0)
    kx1, kx2, kw1, kw2 = jax.random.split(key, 4)

    fwd = jax.jit(basic_block_forward, static_argnames=("stride", "tile_m"))

    # Config 1: projection shortcut (stride=2, channel change) -> fused
    # conv1+shortcut pass 1.  tile_m=64 -> grid of 2 so the multi-tile stats
    # accumulation path is genuinely exercised.
    x1 = jax.random.normal(kx1, (2, 4, 16, 16), jnp.float32)
    p1 = _make_params(kw1, 4, 8, with_shortcut=True)
    out1 = jax.block_until_ready(fwd(x1, p1, stride=2, tile_m=64))
    ref1 = jax.block_until_ready(_ref_basic_block(x1, p1, stride=2))
    assert out1.shape == (2, 8, 8, 8), out1.shape
    np.testing.assert_allclose(np.asarray(out1), np.asarray(ref1),
                               rtol=2e-3, atol=2e-3)

    # Config 2: identity shortcut (stride=1, same channels).
    x2 = jax.random.normal(kx2, (2, 8, 8, 8), jnp.float32)
    p2 = _make_params(kw2, 8, 8, with_shortcut=False)
    out2 = jax.block_until_ready(fwd(x2, p2, stride=1, tile_m=64))
    ref2 = jax.block_until_ready(_ref_basic_block(x2, p2, stride=1))
    assert out2.shape == (2, 8, 8, 8), out2.shape
    np.testing.assert_allclose(np.asarray(out2), np.asarray(ref2),
                               rtol=2e-3, atol=2e-3)

    print("KERNEL_OK")
</pallas_src>

<mosaic_0001>
module attributes {stable_mosaic.version = 11 : i64} {
  func.func @_matmul_stats_kernel(%arg0: i32, %arg1: memref<64x128xbf16, #tpu.memory_space<vmem>>, %arg2: memref<128x256xbf16, #tpu.memory_space<vmem>>, %arg3: memref<64x256xf32, #tpu.memory_space<vmem>>, %arg4: memref<1x256xf32, #tpu.memory_space<vmem>>, %arg5: memref<1x256xf32, #tpu.memory_space<vmem>>) attributes {dimension_semantics = [#tpu.dimension_semantics<arbitrary>], iteration_bounds = array<i64: 2>, scalar_prefetch = 0 : i64, scratch_operands = 0 : i64, tpu.core_type = #tpu.core_type<tc>, window_params = [{transform_indices = @transform_0, window_bounds = array<i64: 64, 128>}, {pipeline_mode = #tpu.pipeline_mode<synchronous>, transform_indices = @transform_1, window_bounds = array<i64: 128, 256>}, {transform_indices = @transform_2, window_bounds = array<i64: 64, 256>}, {pipeline_mode = #tpu.pipeline_mode<synchronous>, transform_indices = @transform_3, window_bounds = array<i64: 1, 256>}, {pipeline_mode = #tpu.pipeline_mode<synchronous>, transform_indices = @transform_4, window_bounds = array<i64: 1, 256>}]} {
    %c0 = arith.constant 0 : index
    %c0_0 = arith.constant 0 : index
    %0 = vector.load %arg1[%c0, %c0_0] : memref<64x128xbf16, #tpu.memory_space<vmem>>, vector<64x128xbf16>
    %c0_1 = arith.constant 0 : index
    %c0_2 = arith.constant 0 : index
    %1 = vector.load %arg2[%c0_1, %c0_2] : memref<128x256xbf16, #tpu.memory_space<vmem>>, vector<128x256xbf16>
    %cst = arith.constant dense<0.000000e+00> : vector<64x256xf32>
    %2 = tpu.matmul %0, %1, %cst {dimension_numbers = #tpu.dot_dimension_numbers<[1], [0], [0], [1], [0, 0, 1, 1], [], []>} : vector<64x128xbf16>, vector<128x256xbf16>, vector<64x256xf32> -> vector<64x256xf32>
    %c0_3 = arith.constant 0 : index
    %c0_4 = arith.constant 0 : index
    %3 = vector.load %arg3[%c0_3, %c0_4] : memref<64x256xf32, #tpu.memory_space<vmem>>, vector<64x256xf32>
    tpu.vector_store %arg3[%c0_3, %c0_4], %2 {strides = array<i32>} : memref<64x256xf32, #tpu.memory_space<vmem>>, vector<64x256xf32>,
    %c0_i32 = arith.constant 0 : i32
    %4 = arith.cmpi eq, %arg0, %c0_i32 : i32
    %5 = arith.extui %4 : i1 to i32
    %c0_i32_5 = arith.constant 0 : i32
    %6 = arith.cmpi ne, %5, %c0_i32_5 : i32
    scf.if %6 {
      %cst_16 = arith.constant 0.000000e+00 : f32
      %18 = vector.broadcast %cst_16 : f32 to vector<1x256xf32>
      %c0_17 = arith.constant 0 : index
      %c0_18 = arith.constant 0 : index
      %19 = vector.load %arg4[%c0_17, %c0_18] : memref<1x256xf32, #tpu.memory_space<vmem>>, vector<1x256xf32>
      tpu.vector_store %arg4[%c0_17, %c0_18], %18 {strides = array<i32>} : memref<1x256xf32, #tpu.memory_space<vmem>>, vector<1x256xf32>,
      %cst_19 = arith.constant 0.000000e+00 : f32
      %20 = vector.broadcast %cst_19 : f32 to vector<1x256xf32>
      %c0_20 = arith.constant 0 : index
      %c0_21 = arith.constant 0 : index
      %21 = vector.load %arg5[%c0_20, %c0_21] : memref<1x256xf32, #tpu.memory_space<vmem>>, vector<1x256xf32>
      tpu.vector_store %arg5[%c0_20, %c0_21], %20 {strides = array<i32>} : memref<1x256xf32, #tpu.memory_space<vmem>>, vector<1x256xf32>,
    } else {
    }
    %c0_6 = arith.constant 0 : index
    %c0_7 = arith.constant 0 : index
    %7 = vector.load %arg4[%c0_6, %c0_7] : memref<1x256xf32, #tpu.memory_space<vmem>>, vector<1x256xf32>
    %cst_8 = arith.constant dense<0.000000e+00> : vector<256xf32>
    %8 = vector.multi_reduction <add>, %2, %cst_8 [0] : vector<64x256xf32> to vector<256xf32>
    %9 = vector.shape_cast %8 : vector<256xf32> to vector<1x256xf32>
    %10 = arith.addf %7, %9 : vector<1x256xf32>
    %c0_9 = arith.constant 0 : index
    %c0_10 = arith.constant 0 : index
    %11 = vector.load %arg4[%c0_9, %c0_10] : memref<1x256xf32, #tpu.memory_space<vmem>>, vector<1x256xf32>
    tpu.vector_store %arg4[%c0_9, %c0_10], %10 {strides = array<i32>} : memref<1x256xf32, #tpu.memory_space<vmem>>, vector<1x256xf32>,
    %c0_11 = arith.constant 0 : index
    %c0_12 = arith.constant 0 : index
    %12 = vector.load %arg5[%c0_11, %c0_12] : memref<1x256xf32, #tpu.memory_space<vmem>>, vector<1x256xf32>
    %13 = arith.mulf %2, %2 : vector<64x256xf32>
    %cst_13 = arith.constant dense<0.000000e+00> : vector<256xf32>
    %14 = vector.multi_reduction <add>, %13, %cst_13 [0] : vector<64x256xf32> to vector<256xf32>
    %15 = vector.shape_cast %14 : vector<256xf32> to vector<1x256xf32>
    %16 = arith.addf %12, %15 : vector<1x256xf32>
    %c0_14 = arith.constant 0 : index
    %c0_15 = arith.constant 0 : index
    %17 = vector.load %arg5[%c0_14, %c0_15] : memref<1x256xf32, #tpu.memory_space<vmem>>, vector<1x256xf32>
    tpu.vector_store %arg5[%c0_14, %c0_15], %16 {strides = array<i32>} : memref<1x256xf32, #tpu.memory_space<vmem>>, vector<1x256xf32>,
    return
  }
  func.func @transform_0(%arg0: i32) -> (i32, i32) {
    %c0_i32 = arith.constant 0 : i32
    %c0_i32_0 = arith.constant 0 : i32
    return %arg0, %c0_i32 : i32, i32
  }
  func.func @transform_1(%arg0: i32) -> (i32, i32) {
    %c0_i32 = arith.constant 0 : i32
    %c0_i32_0 = arith.constant 0 : i32
    %c0_i32_1 = arith.constant 0 : i32
    return %c0_i32, %c0_i32_0 : i32, i32
  }
  func.func @transform_2(%arg0: i32) -> (i32, i32) {
    %c0_i32 = arith.constant 0 : i32
    %c0_i32_0 = arith.constant 0 : i32
    return %arg0, %c0_i32 : i32, i32
  }
  func.func @transform_3(%arg0: i32) -> (i32, i32) {
    %c0_i32 = arith.constant 0 : i32
    %c0_i32_0 = arith.constant 0 : i32
    %c0_i32_1 = arith.constant 0 : i32
    return %c0_i32, %c0_i32_0 : i32, i32
  }
  func.func @transform_4(%arg0: i32) -> (i32, i32) {
    %c0_i32 = arith.constant 0 : i32
    %c0_i32_0 = arith.constant 0 : i32
    %c0_i32_1 = arith.constant 0 : i32
    return %c0_i32, %c0_i32_0 : i32, i32
  }
}

module attributes {stable_mosaic.version = 11 : i64} {
  func.func @_bn_split_kernel(%arg0: i32, %arg1: memref<64x256xf32, #tpu.memory_space<vmem>>, %arg2: memref<1x256xf32, #tpu.memory_space<vmem>>, %arg3: memref<1x256xf32, #tpu.memory_space<vmem>>, %arg4: memref<1x256xf32, #tpu.memory_space<vmem>>, %arg5: memref<1x256xf32, #tpu.memory_space<vmem>>, %arg6: memref<64x128xbf16, #tpu.memory_space<vmem>>, %arg7: memref<64x128xf32, #tpu.memory_space<vmem>>) attributes {dimension_semantics = [#tpu.dimension_semantics<parallel>], iteration_bounds = array<i64: 2>, scalar_prefetch = 0 : i64, scratch_operands = 0 : i64, tpu.core_type = #tpu.core_type<tc>, window_params = [{transform_indices = @transform_0, window_bounds = array<i64: 64, 256>}, {pipeline_mode = #tpu.pipeline_mode<synchronous>, transform_indices = @transform_1, window_bounds = array<i64: 1, 256>}, {pipeline_mode = #tpu.pipeline_mode<synchronous>, transform_indices = @transform_2, window_bounds = array<i64: 1, 256>}, {pipeline_mode = #tpu.pipeline_mode<synchronous>, transform_indices = @transform_3, window_bounds = array<i64: 1, 256>}, {pipeline_mode = #tpu.pipeline_mode<synchronous>, transform_indices = @transform_4, window_bounds = array<i64: 1, 256>}, {transform_indices = @transform_5, window_bounds = array<i64: 64, 128>}, {transform_indices = @transform_6, window_bounds = array<i64: 64, 128>}]} {
    %c0 = arith.constant 0 : index
    %c0_0 = arith.constant 0 : index
    %0 = vector.load %arg2[%c0, %c0_0] : memref<1x256xf32, #tpu.memory_space<vmem>>, vector<1x256xf32>
    %cst = arith.constant 7.812500e-03 : f32
    %1 = vector.broadcast %cst : f32 to vector<1x256xf32>
    %2 = arith.mulf %0, %1 : vector<1x256xf32>
    %c0_1 = arith.constant 0 : index
    %c0_2 = arith.constant 0 : index
    %3 = vector.load %arg3[%c0_1, %c0_2] : memref<1x256xf32, #tpu.memory_space<vmem>>, vector<1x256xf32>
    %cst_3 = arith.constant 7.812500e-03 : f32
    %4 = vector.broadcast %cst_3 : f32 to vector<1x256xf32>
    %5 = arith.mulf %3, %4 : vector<1x256xf32>
    %6 = arith.mulf %2, %2 : vector<1x256xf32>
    %7 = arith.subf %5, %6 : vector<1x256xf32>
    %cst_4 = arith.constant 0.000000e+00 : f32
    %8 = vector.broadcast %cst_4 : f32 to vector<1x256xf32>
    %9 = arith.maximumf %7, %8 : vector<1x256xf32>
    %cst_5 = arith.constant 9.99999974E-6 : f32
    %10 = vector.broadcast %cst_5 : f32 to vector<1x256xf32>
    %11 = arith.addf %9, %10 : vector<1x256xf32>
    %12 = math.rsqrt %11 : vector<1x256xf32>
    %c0_6 = arith.constant 0 : index
    %c0_7 = arith.constant 0 : index
    %13 = vector.load %arg4[%c0_6, %c0_7] : memref<1x256xf32, #tpu.memory_space<vmem>>, vector<1x256xf32>
    %14 = arith.mulf %12, %13 : vector<1x256xf32>
    %c0_8 = arith.constant 0 : index
    %c0_9 = arith.constant 0 : index
    %15 = vector.load %arg5[%c0_8, %c0_9] : memref<1x256xf32, #tpu.memory_space<vmem>>, vector<1x256xf32>
    %16 = arith.mulf %2, %14 : vector<1x256xf32>
    %17 = arith.subf %15, %16 : vector<1x256xf32>
    %c0_10 = arith.constant 0 : index
    %c0_11 = arith.constant 0 : index
    %18 = vector.load %arg1[%c0_10, %c0_11] : memref<64x256xf32, #tpu.memory_space<vmem>>, vector<64x256xf32>
    %19 = vector.broadcast %14 : vector<1x256xf32> to vector<64x256xf32>
    %20 = arith.mulf %18, %19 : vector<64x256xf32>
    %21 = vector.broadcast %17 : vector<1x256xf32> to vector<64x256xf32>
    %22 = arith.addf %20, %21 : vector<64x256xf32>
    %23 = vector.extract_strided_slice %22 {offsets = [0, 0], sizes = [64, 128], strides = [1, 1]} : vector<64x256xf32> to vector<64x128xf32>
    %cst_12 = arith.constant 0.000000e+00 : f32
    %24 = vector.broadcast %cst_12 : f32 to vector<64x128xf32>
    %25 = arith.maximumf %23, %24 : vector<64x128xf32>
    %26 = arith.truncf %25 : vector<64x128xf32> to vector<64x128xbf16>
    %c0_13 = arith.constant 0 : index
    %c0_14 = arith.constant 0 : index
    %27 = vector.load %arg6[%c0_13, %c0_14] : memref<64x128xbf16, #tpu.memory_space<vmem>>, vector<64x128xbf16>
    tpu.vector_store %arg6[%c0_13, %c0_14], %26 {strides = array<i32>} : memref<64x128xbf16, #tpu.memory_space<vmem>>, vector<64x128xbf16>,
    %28 = vector.extract_strided_slice %22 {offsets = [0, 128], sizes = [64, 128], strides = [1, 1]} : vector<64x256xf32> to vector<64x128xf32>
    %c0_15 = arith.constant 0 : index
    %c0_16 = arith.constant 0 : index
    %29 = vector.load %arg7[%c0_15, %c0_16] : memref<64x128xf32, #tpu.memory_space<vmem>>, vector<64x128xf32>
    tpu.vector_store %arg7[%c0_15, %c0_16], %28 {strides = array<i32>} : memref<64x128xf32, #tpu.memory_space<vmem>>, vector<64x128xf32>,
    return
  }
  func.func @transform_0(%arg0: i32) -> (i32, i32) {
    %c0_i32 = arith.constant 0 : i32
    %c0_i32_0 = arith.constant 0 : i32
    return %arg0, %c0_i32 : i32, i32
  }
  func.func @transform_1(%arg0: i32) -> (i32, i32) {
    %c0_i32 = arith.constant 0 : i32
    %c0_i32_0 = arith.constant 0 : i32
    %c0_i32_1 = arith.constant 0 : i32
    return %c0_i32, %c0_i32_0 : i32, i32
  }
  func.func @transform_2(%arg0: i32) -> (i32, i32) {
    %c0_i32 = arith.constant 0 : i32
    %c0_i32_0 = arith.constant 0 : i32
    %c0_i32_1 = arith.constant 0 : i32
    return %c0_i32, %c0_i32_0 : i32, i32
  }
  func.func @transform_3(%arg0: i32) -> (i32, i32) {
    %c0_i32 = arith.constant 0 : i32
    %c0_i32_0 = arith.constant 0 : i32
    %c0_i32_1 = arith.constant 0 : i32
    return %c0_i32, %c0_i32_0 : i32, i32
  }
  func.func @transform_4(%arg0: i32) -> (i32, i32) {
    %c0_i32 = arith.constant 0 : i32
    %c0_i32_0 = arith.constant 0 : i32
    %c0_i32_1 = arith.constant 0 : i32
    return %c0_i32, %c0_i32_0 : i32, i32
  }
  func.func @transform_5(%arg0: i32) -> (i32, i32) {
    %c0_i32 = arith.constant 0 : i32
    %c0_i32_0 = arith.constant 0 : i32
    return %arg0, %c0_i32 : i32, i32
  }
  func.func @transform_6(%arg0: i32) -> (i32, i32) {
    %c0_i32 = arith.constant 0 : i32
    %c0_i32_0 = arith.constant 0 : i32
    return %arg0, %c0_i32 : i32, i32
  }
}

module attributes {stable_mosaic.version = 11 : i64} {
  func.func @_matmul_stats_kernel(%arg0: i32, %arg1: memref<64x128xbf16, #tpu.memory_space<vmem>>, %arg2: memref<128x128xbf16, #tpu.memory_space<vmem>>, %arg3: memref<64x128xf32, #tpu.memory_space<vmem>>, %arg4: memref<1x128xf32, #tpu.memory_space<vmem>>, %arg5: memref<1x128xf32, #tpu.memory_space<vmem>>) attributes {dimension_semantics = [#tpu.dimension_semantics<arbitrary>], iteration_bounds = array<i64: 2>, scalar_prefetch = 0 : i64, scratch_operands = 0 : i64, tpu.core_type = #tpu.core_type<tc>, window_params = [{transform_indices = @transform_0, window_bounds = array<i64: 64, 128>}, {pipeline_mode = #tpu.pipeline_mode<synchronous>, transform_indices = @transform_1, window_bounds = array<i64: 128, 128>}, {transform_indices = @transform_2, window_bounds = array<i64: 64, 128>}, {pipeline_mode = #tpu.pipeline_mode<synchronous>, transform_indices = @transform_3, window_bounds = array<i64: 1, 128>}, {pipeline_mode = #tpu.pipeline_mode<synchronous>, transform_indices = @transform_4, window_bounds = array<i64: 1, 128>}]} {
    %c0 = arith.constant 0 : index
    %c0_0 = arith.constant 0 : index
    %0 = vector.load %arg1[%c0, %c0_0] : memref<64x128xbf16, #tpu.memory_space<vmem>>, vector<64x128xbf16>
    %c0_1 = arith.constant 0 : index
    %c0_2 = arith.constant 0 : index
    %1 = vector.load %arg2[%c0_1, %c0_2] : memref<128x128xbf16, #tpu.memory_space<vmem>>, vector<128x128xbf16>
    %cst = arith.constant dense<0.000000e+00> : vector<64x128xf32>
    %2 = tpu.matmul %0, %1, %cst {dimension_numbers = #tpu.dot_dimension_numbers<[1], [0], [0], [1], [0, 0, 1, 1], [], []>} : vector<64x128xbf16>, vector<128x128xbf16>, vector<64x128xf32> -> vector<64x128xf32>
    %c0_3 = arith.constant 0 : index
    %c0_4 = arith.constant 0 : index
    %3 = vector.load %arg3[%c0_3, %c0_4] : memref<64x128xf32, #tpu.memory_space<vmem>>, vector<64x128xf32>
    tpu.vector_store %arg3[%c0_3, %c0_4], %2 {strides = array<i32>} : memref<64x128xf32, #tpu.memory_space<vmem>>, vector<64x128xf32>,
    %c0_i32 = arith.constant 0 : i32
    %4 = arith.cmpi eq, %arg0, %c0_i32 : i32
    %5 = arith.extui %4 : i1 to i32
    %c0_i32_5 = arith.constant 0 : i32
    %6 = arith.cmpi ne, %5, %c0_i32_5 : i32
    scf.if %6 {
      %cst_16 = arith.constant 0.000000e+00 : f32
      %18 = vector.broadcast %cst_16 : f32 to vector<1x128xf32>
      %c0_17 = arith.constant 0 : index
      %c0_18 = arith.constant 0 : index
      %19 = vector.load %arg4[%c0_17, %c0_18] : memref<1x128xf32, #tpu.memory_space<vmem>>, vector<1x128xf32>
      tpu.vector_store %arg4[%c0_17, %c0_18], %18 {strides = array<i32>} : memref<1x128xf32, #tpu.memory_space<vmem>>, vector<1x128xf32>,
      %cst_19 = arith.constant 0.000000e+00 : f32
      %20 = vector.broadcast %cst_19 : f32 to vector<1x128xf32>
      %c0_20 = arith.constant 0 : index
      %c0_21 = arith.constant 0 : index
      %21 = vector.load %arg5[%c0_20, %c0_21] : memref<1x128xf32, #tpu.memory_space<vmem>>, vector<1x128xf32>
      tpu.vector_store %arg5[%c0_20, %c0_21], %20 {strides = array<i32>} : memref<1x128xf32, #tpu.memory_space<vmem>>, vector<1x128xf32>,
    } else {
    }
    %c0_6 = arith.constant 0 : index
    %c0_7 = arith.constant 0 : index
    %7 = vector.load %arg4[%c0_6, %c0_7] : memref<1x128xf32, #tpu.memory_space<vmem>>, vector<1x128xf32>
    %cst_8 = arith.constant dense<0.000000e+00> : vector<128xf32>
    %8 = vector.multi_reduction <add>, %2, %cst_8 [0] : vector<64x128xf32> to vector<128xf32>
    %9 = vector.shape_cast %8 : vector<128xf32> to vector<1x128xf32>
    %10 = arith.addf %7, %9 : vector<1x128xf32>
    %c0_9 = arith.constant 0 : index
    %c0_10 = arith.constant 0 : index
    %11 = vector.load %arg4[%c0_9, %c0_10] : memref<1x128xf32, #tpu.memory_space<vmem>>, vector<1x128xf32>
    tpu.vector_store %arg4[%c0_9, %c0_10], %10 {strides = array<i32>} : memref<1x128xf32, #tpu.memory_space<vmem>>, vector<1x128xf32>,
    %c0_11 = arith.constant 0 : index
    %c0_12 = arith.constant 0 : index
    %12 = vector.load %arg5[%c0_11, %c0_12] : memref<1x128xf32, #tpu.memory_space<vmem>>, vector<1x128xf32>
    %13 = arith.mulf %2, %2 : vector<64x128xf32>
    %cst_13 = arith.constant dense<0.000000e+00> : vector<128xf32>
    %14 = vector.multi_reduction <add>, %13, %cst_13 [0] : vector<64x128xf32> to vector<128xf32>
    %15 = vector.shape_cast %14 : vector<128xf32> to vector<1x128xf32>
    %16 = arith.addf %12, %15 : vector<1x128xf32>
    %c0_14 = arith.constant 0 : index
    %c0_15 = arith.constant 0 : index
    %17 = vector.load %arg5[%c0_14, %c0_15] : memref<1x128xf32, #tpu.memory_space<vmem>>, vector<1x128xf32>
    tpu.vector_store %arg5[%c0_14, %c0_15], %16 {strides = array<i32>} : memref<1x128xf32, #tpu.memory_space<vmem>>, vector<1x128xf32>,
    return
  }
  func.func @transform_0(%arg0: i32) -> (i32, i32) {
    %c0_i32 = arith.constant 0 : i32
    %c0_i32_0 = arith.constant 0 : i32
    return %arg0, %c0_i32 : i32, i32
  }
  func.func @transform_1(%arg0: i32) -> (i32, i32) {
    %c0_i32 = arith.constant 0 : i32
    %c0_i32_0 = arith.constant 0 : i32
    %c0_i32_1 = arith.constant 0 : i32
    return %c0_i32, %c0_i32_0 : i32, i32
  }
  func.func @transform_2(%arg0: i32) -> (i32, i32) {
    %c0_i32 = arith.constant 0 : i32
    %c0_i32_0 = arith.constant 0 : i32
    return %arg0, %c0_i32 : i32, i32
  }
  func.func @transform_3(%arg0: i32) -> (i32, i32) {
    %c0_i32 = arith.constant 0 : i32
    %c0_i32_0 = arith.constant 0 : i32
    %c0_i32_1 = arith.constant 0 : i32
    return %c0_i32, %c0_i32_0 : i32, i32
  }
  func.func @transform_4(%arg0: i32) -> (i32, i32) {
    %c0_i32 = arith.constant 0 : i32
    %c0_i32_0 = arith.constant 0 : i32
    %c0_i32_1 = arith.constant 0 : i32
    return %c0_i32, %c0_i32_0 : i32, i32
  }
}

module attributes {stable_mosaic.version = 11 : i64} {
  func.func @_bn_add_relu_kernel(%arg0: i32, %arg1: memref<64x128xf32, #tpu.memory_space<vmem>>, %arg2: memref<1x128xf32, #tpu.memory_space<vmem>>, %arg3: memref<1x128xf32, #tpu.memory_space<vmem>>, %arg4: memref<1x128xf32, #tpu.memory_space<vmem>>, %arg5: memref<1x128xf32, #tpu.memory_space<vmem>>, %arg6: memref<64x128xf32, #tpu.memory_space<vmem>>, %arg7: memref<64x128xf32, #tpu.memory_space<vmem>>) attributes {dimension_semantics = [#tpu.dimension_semantics<parallel>], iteration_bounds = array<i64: 2>, scalar_prefetch = 0 : i64, scratch_operands = 0 : i64, tpu.core_type = #tpu.core_type<tc>, window_params = [{transform_indices = @transform_0, window_bounds = array<i64: 64, 128>}, {pipeline_mode = #tpu.pipeline_mode<synchronous>, transform_indices = @transform_1, window_bounds = array<i64: 1, 128>}, {pipeline_mode = #tpu.pipeline_mode<synchronous>, transform_indices = @transform_2, window_bounds = array<i64: 1, 128>}, {pipeline_mode = #tpu.pipeline_mode<synchronous>, transform_indices = @transform_3, window_bounds = array<i64: 1, 128>}, {pipeline_mode = #tpu.pipeline_mode<synchronous>, transform_indices = @transform_4, window_bounds = array<i64: 1, 128>}, {transform_indices = @transform_5, window_bounds = array<i64: 64, 128>}, {transform_indices = @transform_6, window_bounds = array<i64: 64, 128>}]} {
    %c0 = arith.constant 0 : index
    %c0_0 = arith.constant 0 : index
    %0 = vector.load %arg2[%c0, %c0_0] : memref<1x128xf32, #tpu.memory_space<vmem>>, vector<1x128xf32>
    %cst = arith.constant 7.812500e-03 : f32
    %1 = vector.broadcast %cst : f32 to vector<1x128xf32>
    %2 = arith.mulf %0, %1 : vector<1x128xf32>
    %c0_1 = arith.constant 0 : index
    %c0_2 = arith.constant 0 : index
    %3 = vector.load %arg3[%c0_1, %c0_2] : memref<1x128xf32, #tpu.memory_space<vmem>>, vector<1x128xf32>
    %cst_3 = arith.constant 7.812500e-03 : f32
    %4 = vector.broadcast %cst_3 : f32 to vector<1x128xf32>
    %5 = arith.mulf %3, %4 : vector<1x128xf32>
    %6 = arith.mulf %2, %2 : vector<1x128xf32>
    %7 = arith.subf %5, %6 : vector<1x128xf32>
    %cst_4 = arith.constant 0.000000e+00 : f32
    %8 = vector.broadcast %cst_4 : f32 to vector<1x128xf32>
    %9 = arith.maximumf %7, %8 : vector<1x128xf32>
    %cst_5 = arith.constant 9.99999974E-6 : f32
    %10 = vector.broadcast %cst_5 : f32 to vector<1x128xf32>
    %11 = arith.addf %9, %10 : vector<1x128xf32>
    %12 = math.rsqrt %11 : vector<1x128xf32>
    %c0_6 = arith.constant 0 : index
    %c0_7 = arith.constant 0 : index
    %13 = vector.load %arg4[%c0_6, %c0_7] : memref<1x128xf32, #tpu.memory_space<vmem>>, vector<1x128xf32>
    %14 = arith.mulf %12, %13 : vector<1x128xf32>
    %c0_8 = arith.constant 0 : index
    %c0_9 = arith.constant 0 : index
    %15 = vector.load %arg5[%c0_8, %c0_9] : memref<1x128xf32, #tpu.memory_space<vmem>>, vector<1x128xf32>
    %16 = arith.mulf %2, %14 : vector<1x128xf32>
    %17 = arith.subf %15, %16 : vector<1x128xf32>
    %c0_10 = arith.constant 0 : index
    %c0_11 = arith.constant 0 : index
    %18 = vector.load %arg1[%c0_10, %c0_11] : memref<64x128xf32, #tpu.memory_space<vmem>>, vector<64x128xf32>
    %19 = vector.broadcast %14 : vector<1x128xf32> to vector<64x128xf32>
    %20 = arith.mulf %18, %19 : vector<64x128xf32>
    %21 = vector.broadcast %17 : vector<1x128xf32> to vector<64x128xf32>
    %22 = arith.addf %20, %21 : vector<64x128xf32>
    %c0_12 = arith.constant 0 : index
    %c0_13 = arith.constant 0 : index
    %23 = vector.load %arg6[%c0_12, %c0_13] : memref<64x128xf32, #tpu.memory_space<vmem>>, vector<64x128xf32>
    %24 = arith.addf %22, %23 : vector<64x128xf32>
    %cst_14 = arith.constant 0.000000e+00 : f32
    %25 = vector.broadcast %cst_14 : f32 to vector<64x128xf32>
    %26 = arith.maximumf %24, %25 : vector<64x128xf32>
    %c0_15 = arith.constant 0 : index
    %c0_16 = arith.constant 0 : index
    %27 = vector.load %arg7[%c0_15, %c0_16] : memref<64x128xf32, #tpu.memory_space<vmem>>, vector<64x128xf32>
    tpu.vector_store %arg7[%c0_15, %c0_16], %26 {strides = array<i32>} : memref<64x128xf32, #tpu.memory_space<vmem>>, vector<64x128xf32>,
    return
  }
  func.func @transform_0(%arg0: i32) -> (i32, i32) {
    %c0_i32 = arith.constant 0 : i32
    %c0_i32_0 = arith.constant 0 : i32
    return %arg0, %c0_i32 : i32, i32
  }
  func.func @transform_1(%arg0: i32) -> (i32, i32) {
    %c0_i32 = arith.constant 0 : i32
    %c0_i32_0 = arith.constant 0 : i32
    %c0_i32_1 = arith.constant 0 : i32
    return %c0_i32, %c0_i32_0 : i32, i32
  }
  func.func @transform_2(%arg0: i32) -> (i32, i32) {
    %c0_i32 = arith.constant 0 : i32
    %c0_i32_0 = arith.constant 0 : i32
    %c0_i32_1 = arith.constant 0 : i32
    return %c0_i32, %c0_i32_0 : i32, i32
  }
  func.func @transform_3(%arg0: i32) -> (i32, i32) {
    %c0_i32 = arith.constant 0 : i32
    %c0_i32_0 = arith.constant 0 : i32
    %c0_i32_1 = arith.constant 0 : i32
    return %c0_i32, %c0_i32_0 : i32, i32
  }
  func.func @transform_4(%arg0: i32) -> (i32, i32) {
    %c0_i32 = arith.constant 0 : i32
    %c0_i32_0 = arith.constant 0 : i32
    %c0_i32_1 = arith.constant 0 : i32
    return %c0_i32, %c0_i32_0 : i32, i32
  }
  func.func @transform_5(%arg0: i32) -> (i32, i32) {
    %c0_i32 = arith.constant 0 : i32
    %c0_i32_0 = arith.constant 0 : i32
    return %arg0, %c0_i32 : i32, i32
  }
  func.func @transform_6(%arg0: i32) -> (i32, i32) {
    %c0_i32 = arith.constant 0 : i32
    %c0_i32_0 = arith.constant 0 : i32
    return %arg0, %c0_i32 : i32, i32
  }
}

</mosaic_0001>

<bundles_post_ra>
// kernel: basic_block_forward.5
= control target key start
LH: loop header
LB: loop body
LE: loop exit
PB: predicated region body
PF: predicated region fallthrough
CT: control target
= control target key end

     0   :  { %s609_s21 = smov 0   ;;  %s674_s0 = inlined_call_operand.vmem [shape: f32[128,256], index: 0, kind: input, shape index: {}]   ;;  %s675_s1 = inlined_call_operand.vmem [shape: f32[1,256], index: 1, kind: input, shape index: {}]   ;;  %s676_s2 = inlined_call_operand.vmem [shape: f32[1,256], index: 2, kind: input, shape index: {}]   ;;  %s677_s3 = inlined_call_operand.vmem [shape: f32[1,256], index: 3, kind: input, shape index: {}]   ;;  %s678_s4 = inlined_call_operand.vmem [shape: f32[1,256], index: 4, kind: input, shape index: {}]   ;;  %s679_s5 = inlined_call_operand.vmem [shape: bf16[128,128], index: 5, kind: output, shape index: {0}]   ;;  %s680_s6 = inlined_call_operand.vmem [shape: f32[128,128], index: 6, kind: output, shape index: {1}]  }
   0x1 LB: > { %s502_s22 = sadd.s32 4294967295, %s572_s21   ;;  %p506_p0 = scmp.ge.s32.totalorder %s572_s21, 1  ;;  %s572_s21 = sphi %s609_s21, %s17_s21  }
   0x2   : > { %p217_p1 = scmp.lt.s32.totalorder %s572_s21, 3 }
   0x4   : > { %p218_p2 = pnand %p506_p0, %p217_p1 }
   0x5   : > { %v272_v0 = vld [vmem:[%s675_s1] sm:$0x3] (!%p218_p2)  ;;  %s507_s27 = sshll.u32 (!%p218_p2), %s502_s22, 3  ;;  %v303_v8 = vlaneseq (!%p218_p2) }
   0x6   : > { %221 = sbr.rel (%p218_p2) target bundleno = 47 (0x2f), region = 40  ;;  %v274_v1 = vld [vmem:[%s676_s2] sm:$0x3] (!%p218_p2)  ;;  %v273_v2 = vmul.f32 (!%p218_p2), 0.0078125, %v272_v0  ;;  %p254_p3 = scmp.lt.s32.totalorder (!%p218_p2), %s507_s27, 15 }
   0x7   : > { %v275_v3 = vmul.f32 (!%p218_p2), 0.0078125, %v274_v1  ;;  %v304_v9 = vshrl.u32 (!%p218_p2), %v303_v8, 7  ;;  %v281_v10 = vld [vmem:[%s677_s3] sm:$0x3] (!%p218_p2) }
   0x8   : > { %v276_v4 = vmul.f32 (!%p218_p2), %v273_v2, %v273_v2  ;;  %v283_v15 = vld [vmem:[%s678_s4] sm:$0x3] (!%p218_p2) }
   0x9   : > { %v305_v11 = vsub.s32 (!%p218_p2), 0, %v304_v9  ;;  %v309_v12 = vsub.s32 (!%p218_p2), 1, %v304_v9 }
   0xa   : > { %v277_v5 = vsub.f32 (!%p218_p2), %v275_v3, %v276_v4 }
   0xc   : > { %v278_v6 = vmax.f32 (!%p218_p2), %v277_v5, 0.0 }
   0xd   : > { %s682_s27 = smov (!%p254_p3, %s507_s27), 15 }
   0xe   : > { %v279_v7 = vadd.f32 1e-05, %v278_v6  ;;  %s524_s28 = sshll.u32 %s682_s27, 4  ;;  %s511_s12 = sshll.u32 %s682_s27, 2 }
   0xf   : > { %s629_s7 = scalar_lea.vmem %s674_s0, %s524_s28  ;;  %s513_s13 = sshll.u32 %s682_s27, 3 }
  0x10   : > { %564 = vrsqrt.f32 %v279_v7  ;;  %v286_v16 = vld [vmem:[%s629_s7] sm:$0xff]  ;;  %v288_v17 = vld [vmem:[%s629_s7 + $0x10] sm:$0xff]  ;;  %v287_v27 = vld [vmem:[%s629_s7 + $0x8] sm:$0xff]  ;;  %s264_s16 = scalar_lea.vmem %s679_s5, %s511_s12  ;;  %s659_s19 = scalar_lea.vmem %s680_s6, %s513_s13 }
  0x11   : > { %v290_v18 = vld [vmem:[%s629_s7 + $0x20] sm:$0xff]  ;;  %v292_v19 = vld [vmem:[%s629_s7 + $0x30] sm:$0xff]  ;;  %v289_v28 = vld [vmem:[%s629_s7 + $0x18] sm:$0xff] }
  0x12   : > { %v294_v22 = vld [vmem:[%s629_s7 + $0x40] sm:$0xff]  ;;  %v296_v23 = vld [vmem:[%s629_s7 + $0x50] sm:$0xff]  ;;  %v291_v33 = vld [vmem:[%s629_s7 + $0x28] sm:$0xff] }
  0x13   : > { %v298_v24 = vld [vmem:[%s629_s7 + $0x60] sm:$0xff]  ;;  %v300_v26 = vld [vmem:[%s629_s7 + $0x70] sm:$0xff]  ;;  %v293_v34 = vld [vmem:[%s629_s7 + $0x38] sm:$0xff] }
  0x14   : > { %v295_v35 = vld [vmem:[%s629_s7 + $0x48] sm:$0xff]  ;;  %v297_v60 = vld [vmem:[%s629_s7 + $0x58] sm:$0xff] }
  0x15   : > { %v299_v1 = vld [vmem:[%s629_s7 + $0x68] sm:$0xff] }
  0x1a   : > { %v565_v13 = vpop.eup %564 }
  0x1b   : > { %v282_v14 = vmul.f32 %v565_v13, %v281_v10 }
  0x1d   : > { %v284_v20 = vmul.f32 %v282_v14, %v273_v2  ;;  %v306_v21 = vrot.slane %v282_v14, %v305_v11  ;;  %v310_v25 = vrot.slane %v282_v14, %v309_v12  ;;  %v301_v2 = vld [vmem:[%s629_s7 + $0x78] sm:$0xff] }
  0x1f   : > { %v285_v29 = vsub.f32 %v283_v15, %v284_v20  ;;  %v313_v30 = vmul.f32 %v306_v21, %v286_v16  ;;  %v315_v31 = vmul.f32 %v306_v21, %v288_v17  ;;  %v317_v32 = vmul.f32 %v306_v21, %v290_v18 }
  0x20   : > { %v319_v36 = vmul.f32 %v306_v21, %v292_v19  ;;  %v321_v37 = vmul.f32 %v306_v21, %v294_v22  ;;  %v323_v38 = vmul.f32 %v306_v21, %v296_v23  ;;  %v325_v39 = vmul.f32 %v306_v21, %v298_v24 }
  0x21   : > { %v333_v40 = vrot.slane %v285_v29, %v305_v11  ;;  %v327_v41 = vmul.f32 %v306_v21, %v300_v26  ;;  %v314_v42 = vmul.f32 %v310_v25, %v287_v27  ;;  %v337_v43 = vrot.slane %v285_v29, %v309_v12 }
  0x22   : > { %v316_v44 = vmul.f32 %v310_v25, %v289_v28  ;;  %v318_v45 = vmul.f32 %v310_v25, %v291_v33  ;;  %v320_v46 = vmul.f32 %v310_v25, %v293_v34  ;;  %v322_v47 = vmul.f32 %v310_v25, %v295_v35 }
  0x23   : > { %v340_v48 = vadd.f32 %v333_v40, %v313_v30  ;;  %v342_v49 = vadd.f32 %v333_v40, %v315_v31  ;;  %v344_v50 = vadd.f32 %v333_v40, %v317_v32  ;;  %v346_v51 = vadd.f32 %v333_v40, %v319_v36 }
  0x24   : > { %v348_v52 = vadd.f32 %v333_v40, %v321_v37  ;;  %v350_v53 = vadd.f32 %v333_v40, %v323_v38  ;;  %v352_v54 = vadd.f32 %v333_v40, %v325_v39  ;;  %v354_v55 = vadd.f32 %v333_v40, %v327_v41 }
  0x25   : > { %v356_v56 = vmax.f32 %v340_v48, 0.0  ;;  %v357_v57 = vmax.f32 %v342_v49, 0.0  ;;  %v358_v58 = vmax.f32 %v344_v50, 0.0  ;;  %v359_v59 = vmax.f32 %v346_v51, 0.0 }
  0x26   : > { %v360_v61 = vmax.f32 %v348_v52, 0.0  ;;  %v361_v62 = vmax.f32 %v350_v53, 0.0  ;;  %v362_v63 = vmax.f32 %v352_v54, 0.0  ;;  %v363_v0 = vmax.f32 %v354_v55, 0.0 }
  0x27   : > { %v536_v3 = vpack.c.bf16 %v357_v57, %v356_v56  ;;  %v541_v4 = vpack.c.bf16 %v359_v59, %v358_v58  ;;  %v341_v5 = vadd.f32 %v337_v43, %v314_v42  ;;  %v343_v6 = vadd.f32 %v337_v43, %v316_v44 }
  0x28   : > { %v546_v7 = vpack.c.bf16 %v361_v62, %v360_v61  ;;  %v551_v8 = vpack.c.bf16 %v363_v0, %v362_v63  ;;  %v345_v9 = vadd.f32 %v337_v43, %v318_v45  ;;  %v347_v10 = vadd.f32 %v337_v43, %v320_v46 }
  0x29   : > { %537 = vst [vmem:[%s264_s16] sm:$0xff] %v536_v3   ;;  %553 = vst [vmem:[%s264_s16 + $0x8] sm:$0xff] %v541_v4   ;;  %v349_v11 = vadd.f32 %v337_v43, %v322_v47  ;;  %v324_v12 = vmul.f32 %v310_v25, %v297_v60  ;;  %v326_v13 = vmul.f32 %v310_v25, %v299_v1 }
  0x2a   : > { %404 = vst [vmem:[%s659_s19] sm:$0xff] %v341_v5  ;;  %405 = vst [vmem:[%s659_s19 + $0x8] sm:$0xff] %v343_v6  ;;  %v328_v14 = vmul.f32 %v310_v25, %v301_v2 }
  0x2b   : > { %554 = vst [vmem:[%s264_s16 + $0x10] sm:$0xff] %v546_v7   ;;  %555 = vst [vmem:[%s264_s16 + $0x18] sm:$0xff] %v551_v8   ;;  %v351_v15 = vadd.f32 %v337_v43, %v324_v12  ;;  %v353_v16 = vadd.f32 %v337_v43, %v326_v13 }
  0x2c   : > { %406 = vst [vmem:[%s659_s19 + $0x10] sm:$0xff] %v345_v9  ;;  %407 = vst [vmem:[%s659_s19 + $0x18] sm:$0xff] %v347_v10  ;;  %v355_v17 = vadd.f32 %v337_v43, %v328_v14 }
  0x2d   : > { %408 = vst [vmem:[%s659_s19 + $0x20] sm:$0xff] %v349_v11  ;;  %409 = vst [vmem:[%s659_s19 + $0x28] sm:$0xff] %v351_v15 }
  0x2e   : > { %410 = vst [vmem:[%s659_s19 + $0x30] sm:$0xff] %v353_v16  ;;  %411 = vst [vmem:[%s659_s19 + $0x38] sm:$0xff] %v355_v17 }
  0x2f PF: > { %s17_s21 = sadd.s32 1, %s572_s21  }
  0x30   : > { %p14_p4 = scmp.ge.s32.totalorder %s17_s21, 4  }
  0x32   :  { %16 = sbr.rel (!%p14_p4) target bundleno = 1 (0x1), region = 82 }

// kernel: basic_block_forward.4
= control target key start
LH: loop header
LB: loop body
LE: loop exit
PB: predicated region body
PF: predicated region fallthrough
CT: control target
= control target key end

     0   :  { %s735_s15 = smov 0   ;;  %s850_s0 = inlined_call_operand.vmem [shape: bf16[128,128], index: 0, kind: input, shape index: {}]   ;;  %s851_s1 = inlined_call_operand.vmem [shape: bf16[128,256], index: 1, kind: input, shape index: {}]   ;;  %s852_s2 = inlined_call_operand.vmem [shape: f32[128,256], index: 2, kind: output, shape index: {0}]   ;;  %s853_s3 = inlined_call_operand.vmem [shape: f32[1,256], index: 3, kind: output, shape index: {1}]   ;;  %s854_s4 = inlined_call_operand.vmem [shape: f32[1,256], index: 4, kind: output, shape index: {2}]  }
   0x1 LB: > { %s610_s16 = sadd.s32 4294967295, %s705_s15   ;;  %p614_p0 = scmp.ge.s32.totalorder %s705_s15, 1  ;;  %s705_s15 = sphi %s735_s15, %s15_s15  }
   0x2   : > { %p158_p1 = scmp.lt.s32.totalorder %s705_s15, 3 }
   0x4   : > { %p159_p2 = pnand %p614_p0, %p158_p1 }
   0x5   : > { %v671_v0 = vld [vmem:[%s851_s1 + $0x4] ss:$8 sps:$4 sm:$0xff] (!%p159_p2)   ;;  %s615_s19 = sshll.u32 (!%p159_p2), %s610_s16, 3  ;;  %v673_v1 = vld [vmem:[%s851_s1] ss:$8 sps:$4 sm:$0xff] (!%p159_p2)   ;;  %v707_v2 = vmov (!%p159_p2), 0  }
   0x6   : > { %162 = sbr.rel (%p159_p2) target bundleno = 301 (0x12d), region = 28  ;;  %359 = vmatprep.mubr.bf16.mxu0 (!%p159_p2), %v707_v2  ;;  %379 = vmatprep.mubr.bf16.mxu1 (!%p159_p2), %v707_v2  ;;  %p186_p3 = scmp.lt.s32.totalorder (!%p159_p2), %s615_s19, 15  ;;  %v674_v3 = vld [vmem:[%s851_s1 + $0x14] ss:$8 sps:$4 sm:$0xff] (!%p159_p2)   ;;  %v676_v4 = vld [vmem:[%s851_s1 + $0x10] ss:$8 sps:$4 sm:$0xff] (!%p159_p2)  }
   0x7   : > { %327 = vmatprep.subr.bf16.mxu0 (!%p159_p2), %v671_v0  ;;  %644 = vmatprep.subr.bf16.mxu1 (!%p159_p2), %v671_v0  ;;  %v677_v5 = vld [vmem:[%s851_s1 + $0x24] ss:$8 sps:$4 sm:$0xff] (!%p159_p2)   ;;  %v679_v6 = vld [vmem:[%s851_s1 + $0x20] ss:$8 sps:$4 sm:$0xff] (!%p159_p2)   ;;  %v680_v7 = vld [vmem:[%s851_s1 + $0x34] ss:$8 sps:$4 sm:$0xff] (!%p159_p2)  }
   0x8   : > { %328 = vmatpush1.bf16.msra.mxu0 (!%p159_p2), %v673_v1  ;;  %652 = vmatpush1.bf16.msra.mxu1 (!%p159_p2), %v673_v1  ;;  %v682_v8 = vld [vmem:[%s851_s1 + $0x30] ss:$8 sps:$4 sm:$0xff] (!%p159_p2)   ;;  %v683_v9 = vld [vmem:[%s851_s1 + $0x44] ss:$8 sps:$4 sm:$0xff] (!%p159_p2)   ;;  %v685_v10 = vld [vmem:[%s851_s1 + $0x40] ss:$8 sps:$4 sm:$0xff] (!%p159_p2)  }
   0x9   : > { %329 = vmatprep.subr.bf16.mxu0 (!%p159_p2), %v674_v3  ;;  %645 = vmatprep.subr.bf16.mxu1 (!%p159_p2), %v674_v3  ;;  %v686_v11 = vld [vmem:[%s851_s1 + $0x54] ss:$8 sps:$4 sm:$0xff] (!%p159_p2)   ;;  %v688_v12 = vld [vmem:[%s851_s1 + $0x50] ss:$8 sps:$4 sm:$0xff] (!%p159_p2)   ;;  %v689_v13 = vld [vmem:[%s851_s1 + $0x64] ss:$8 sps:$4 sm:$0xff] (!%p159_p2)  }
   0xa   : > { %v691_v14 = vld [vmem:[%s851_s1 + $0x60] ss:$8 sps:$4 sm:$0xff] (!%p159_p2)   ;;  %v692_v15 = vld [vmem:[%s851_s1 + $0x74] ss:$8 sps:$4 sm:$0xff] (!%p159_p2)   ;;  %v694_v16 = vld [vmem:[%s851_s1 + $0x70] ss:$8 sps:$4 sm:$0xff] (!%p159_p2)  }
   0xb   : > { %p640_p4 = scmp.ne.s32.totalorder (!%p159_p2), %s610_s16, 0 }
   0xc   : > { %330 = vmatpush1.bf16.msra.mxu0 (!%p159_p2), %v676_v4  ;;  %653 = vmatpush1.bf16.msra.mxu1 (!%p159_p2), %v676_v4 }
   0xd   : > { %s856_s19 = smov (!%p186_p3, %s615_s19), 15  ;;  %331 = vmatprep.subr.bf16.mxu0 %v677_v5  ;;  %646 = vmatprep.subr.bf16.mxu1 %v677_v5  ;;  %v420_v37 = vlaneseq (!%p640_p4)  ;;  %v708_v38 = vmov (!%p640_p4), 0.0  }
   0xe   : > { %s616_s28 = sshll.u32 %s856_s19, 2  ;;  %s643_s5 = sshll.u32 %s856_s19, 4 }
   0xf   : > { %s772_s9 = scalar_lea.vmem %s850_s0, %s616_s28  ;;  %s809_s8 = scalar_lea.vmem %s852_s2, %s643_s5  ;;  %vm422_vm0 = vcmp.lt.s32.totalorder (!%p640_p4), %v420_v37, 256 }
  0x10   : > { %332 = vmatpush1.bf16.msra.mxu0 %v679_v6  ;;  %654 = vmatpush1.bf16.msra.mxu1 %v679_v6  ;;  %v695_v17 = vld [vmem:[%s772_s9] sm:$0xff]   ;;  %v696_v18 = vld [vmem:[%s772_s9 + $0x10] sm:$0xff]   ;;  %v697_v19 = vld [vmem:[%s772_s9 + $0x8] sm:$0xff]   ;;  %424 = vst.msk [vmem:[%s853_s3] sm:$0x3] (!%p640_p4), %vm422_vm0, %v708_v38 }
  0x11   : > { %333 = vmatprep.subr.bf16.mxu0 %v680_v7  ;;  %647 = vmatprep.subr.bf16.mxu1 %v680_v7  ;;  %v698_v20 = vld [vmem:[%s772_s9 + $0x18] sm:$0xff]   ;;  %425 = vst.msk [vmem:[%s854_s4] sm:$0x3] (!%p640_p4), %vm422_vm0, %v708_v38 }
  0x14   : > { %334 = vmatpush1.bf16.msra.mxu0 %v682_v8  ;;  %655 = vmatpush1.bf16.msra.mxu1 %v682_v8 }
  0x15   : > { %335 = vmatprep.subr.bf16.mxu0 %v683_v9  ;;  %648 = vmatprep.subr.bf16.mxu1 %v683_v9 }
  0x18   : > { %336 = vmatpush1.bf16.msra.mxu0 %v685_v10  ;;  %656 = vmatpush1.bf16.msra.mxu1 %v685_v10 }
  0x19   : > { %337 = vmatprep.subr.bf16.mxu0 %v686_v11  ;;  %649 = vmatprep.subr.bf16.mxu1 %v686_v11 }
  0x1c   : > { %338 = vmatpush1.bf16.msra.mxu0 %v688_v12  ;;  %657 = vmatpush1.bf16.msra.mxu1 %v688_v12 }
  0x1d   : > { %339 = vmatprep.subr.bf16.mxu0 %v689_v13  ;;  %650 = vmatprep.subr.bf16.mxu1 %v689_v13 }
  0x20   : > { %340 = vmatpush1.bf16.msra.mxu0 %v691_v14  ;;  %658 = vmatpush1.bf16.msra.mxu1 %v691_v14 }
  0x21   : > { %341 = vmatprep.subr.bf16.mxu0 %v692_v15  ;;  %651 = vmatprep.subr.bf16.mxu1 %v692_v15 }
  0x24   : > { %342 = vmatpush1.bf16.msra.mxu0 %v694_v16  ;;  %659 = vmatpush1.bf16.msra.mxu1 %v694_v16 }
  0x27   : > { %360 = vmatmul.mubr.bf16.vlgmr.msra.gmra.mrb[0].mxu0 %v695_v17  ;;  %380 = vmatmul.mubr.bf16.vlgmr.msra.gmra.mrb[0].mxu1 %v696_v18 }
  0x28   : > { %369 = vmatprep.mubr.bf16.mxu0 %v707_v2  ;;  %389 = vmatprep.mubr.bf16.mxu1 %v707_v2 }
  0x2f   : > { %370 = vmatmul.mubr.bf16.gmra.mrb[4].mxu0 %v697_v19  ;;  %390 = vmatmul.mubr.bf16.gmra.mrb[4].mxu1 %v698_v20 }
  0xfa   : > { %v361_v21 = vpop.f32.mrb[0].mxu0  ;;  %v381_v22 = vpop.f32.mrb[0].mxu1 }
  0xfb   : > { %400 = vst [vmem:[%s809_s8] sm:$0xff] %v361_v21  ;;  %408 = vst [vmem:[%s809_s8 + $0x40] sm:$0xff] %v381_v22  ;;  %v363_v23 = vpop.f32.mrb[1].mxu0  ;;  %v383_v24 = vpop.f32.mrb[1].mxu1 }
  0xfc   : > { %401 = vst [vmem:[%s809_s8 + $0x8] sm:$0xff] %v363_v23  ;;  %409 = vst [vmem:[%s809_s8 + $0x48] sm:$0xff] %v383_v24  ;;  %v365_v25 = vpop.f32.mrb[2].mxu0  ;;  %v385_v26 = vpop.f32.mrb[2].mxu1 }
  0xfd   : > { %402 = vst [vmem:[%s809_s8 + $0x10] sm:$0xff] %v365_v25  ;;  %410 = vst [vmem:[%s809_s8 + $0x50] sm:$0xff] %v385_v26  ;;  %v367_v27 = vpop.f32.mrb[3].mxu0  ;;  %v387_v28 = vpop.f32.mrb[3].mxu1 }
  0xfe   : > { %403 = vst [vmem:[%s809_s8 + $0x18] sm:$0xff] %v367_v27  ;;  %411 = vst [vmem:[%s809_s8 + $0x58] sm:$0xff] %v387_v28 }
 0x100   : > { %419 = sbr.rel (%p640_p4) target bundleno = 263 (0x107), region = 32 }
 0x102   : > { %v371_v29 = vpop.f32.mrb[4].mxu0  ;;  %v391_v30 = vpop.f32.mrb[4].mxu1 }
 0x103   : > { %404 = vst [vmem:[%s809_s8 + $0x20] sm:$0xff] %v371_v29  ;;  %412 = vst [vmem:[%s809_s8 + $0x60] sm:$0xff] %v391_v30  ;;  %v373_v31 = vpop.f32.mrb[5].mxu0  ;;  %v393_v32 = vpop.f32.mrb[5].mxu1 }
 0x104   : > { %405 = vst [vmem:[%s809_s8 + $0x28] sm:$0xff] %v373_v31  ;;  %413 = vst [vmem:[%s809_s8 + $0x68] sm:$0xff] %v393_v32  ;;  %v375_v33 = vpop.f32.mrb[6].mxu0  ;;  %v395_v34 = vpop.f32.mrb[6].mxu1 }
 0x105   : > { %406 = vst [vmem:[%s809_s8 + $0x30] sm:$0xff] %v375_v33  ;;  %414 = vst [vmem:[%s809_s8 + $0x70] sm:$0xff] %v395_v34  ;;  %v377_v35 = vpop.f32.mrb[7].mxu0  ;;  %v397_v36 = vpop.f32.mrb[7].mxu1 }
 0x106   : > { %407 = vst [vmem:[%s809_s8 + $0x38] sm:$0xff] %v377_v35  ;;  %415 = vst [vmem:[%s809_s8 + $0x78] sm:$0xff] %v397_v36 }
 0x107 PF: > { %v427_v39 = vadd.f32 %v365_v25, %v361_v21  ;;  %v440_v40 = vadd.f32 %v367_v27, %v363_v23  ;;  %v478_v43 = vmul.f32 %v361_v21, %v361_v21  ;;  %v480_v44 = vmul.f32 %v365_v25, %v365_v25 }
 0x108   : > { %v479_v47 = vmul.f32 %v363_v23, %v363_v23  ;;  %v481_v48 = vmul.f32 %v367_v27, %v367_v27  ;;  %v482_v49 = vmul.f32 %v371_v29, %v371_v29  ;;  %v483_v52 = vmul.f32 %v373_v31, %v373_v31 }
 0x109   : > { %v428_v41 = vadd.f32 %v427_v39, %v371_v29  ;;  %v441_v42 = vadd.f32 %v440_v40, %v373_v31  ;;  %v484_v53 = vmul.f32 %v375_v33, %v375_v33  ;;  %v494_v54 = vadd.f32 %v480_v44, %v478_v43 }
 0x10a   : > { %v485_v57 = vmul.f32 %v377_v35, %v377_v35  ;;  %v507_v58 = vadd.f32 %v481_v48, %v479_v47  ;;  %v486_v59 = vmul.f32 %v381_v22, %v381_v22  ;;  %v487_v63 = vmul.f32 %v383_v24, %v383_v24  ;;  %v426_v47 = vld [vmem:[%s853_s3] sm:$0x3] }
 0x10b   : > { %v429_v45 = vadd.f32 %v428_v41, %v375_v33  ;;  %v442_v46 = vadd.f32 %v441_v42, %v377_v35  ;;  %v495_v60 = vadd.f32 %v494_v54, %v482_v49  ;;  %v488_v1 = vmul.f32 %v385_v26, %v385_v26 }
 0x10c   : > { %v508_v0 = vadd.f32 %v507_v58, %v483_v52  ;;  %v489_v5 = vmul.f32 %v387_v28, %v387_v28  ;;  %v490_v7 = vmul.f32 %v391_v30, %v391_v30  ;;  %v491_v11 = vmul.f32 %v393_v32, %v393_v32 }
 0x10d   : > { %v430_v50 = vadd.f32 %v429_v45, %v381_v22  ;;  %v443_v51 = vadd.f32 %v442_v46, %v383_v24  ;;  %v496_v2 = vadd.f32 %v495_v60, %v484_v53  ;;  %v709_v13 = vmov 1966171168  }
 0x10e   : > { %v509_v6 = vadd.f32 %v508_v0, %v485_v57  ;;  %v457_v14 = vunpack.c.l.s4 %v709_v13  ;;  %v459_v15 = vlaneseq  ;;  %v492_v16 = vmul.f32 %v395_v34, %v395_v34 }
 0x10f   : > { %v431_v55 = vadd.f32 %v430_v50, %v385_v26  ;;  %v444_v56 = vadd.f32 %v443_v51, %v387_v28  ;;  %v497_v8 = vadd.f32 %v496_v2, %v486_v59  ;;  %v493_v20 = vmul.f32 %v397_v36, %v397_v36 }
 0x110   : > { %v510_v12 = vadd.f32 %v509_v6, %v487_v63  ;;  %v460_v26 = vshrl.u32 %v459_v15, 7  ;;  %vm474_vm1 = vcmp.lt.s32.totalorder %v459_v15, 256 }
 0x111   : > { %v432_v61 = vadd.f32 %v431_v55, %v391_v30  ;;  %v445_v62 = vadd.f32 %v444_v56, %v393_v32  ;;  %v498_v17 = vadd.f32 %v497_v8, %v488_v1  ;;  %v458_v30 = vunpack.c.0.s8 %v457_v14  ;;  %v477_v56 = vld [vmem:[%s854_s4] sm:$0x3] }
 0x112   : > { %v511_v21 = vadd.f32 %v510_v12, %v489_v5 }
 0x113   : > { %v433_v3 = vadd.f32 %v432_v61, %v395_v34  ;;  %v446_v4 = vadd.f32 %v445_v62, %v397_v36  ;;  %v499_v22 = vadd.f32 %v498_v17, %v490_v7  ;;  %v461_v40 = vsub.s32 %v458_v30, %v460_v26 }
 0x114   : > { %v512_v25 = vadd.f32 %v511_v21, %v491_v11 }
 0x115   : > { %v434_v9 = vrot.slane %v433_v3, 4  ;;  %v447_v10 = vrot.slane %v446_v4, 4  ;;  %v500_v27 = vadd.f32 %v499_v22, %v492_v16 }
 0x116   : > { %v513_v31 = vadd.f32 %v512_v25, %v493_v20 }
 0x117   : > { %v435_v18 = vadd.f32 %v434_v9, %v433_v3  ;;  %v448_v19 = vadd.f32 %v447_v10, %v446_v4  ;;  %v501_v32 = vrot.slane %v500_v27, 4 }
 0x118   : > { %v514_v37 = vrot.slane %v513_v31, 4 }
 0x119   : > { %v436_v23 = vrot.slane %v435_v18, 2  ;;  %v449_v24 = vrot.slane %v448_v19, 2  ;;  %v502_v34 = vadd.f32 %v501_v32, %v500_v27 }
 0x11a   : > { %v515_v36 = vadd.f32 %v514_v37, %v513_v31 }
 0x11b   : > { %v437_v28 = vadd.f32 %v436_v23, %v435_v18  ;;  %v450_v29 = vadd.f32 %v449_v24, %v448_v19  ;;  %v503_v41 = vrot.slane %v502_v34, 2 }
 0x11c   : > { %v516_v43 = vrot.slane %v515_v36, 2 }
 0x11d   : > { %v438_v33 = vrot.slane %v437_v28, 1  ;;  %v451_v35 = vrot.slane %v450_v29, 1  ;;  %v504_v44 = vadd.f32 %v503_v41, %v502_v34 }
 0x11e   : > { %v517_v46 = vadd.f32 %v516_v43, %v515_v36 }
 0x11f   : > { %v439_v38 = vadd.f32 %v438_v33, %v437_v28  ;;  %v452_v39 = vadd.f32 %v451_v35, %v450_v29  ;;  %v505_v48 = vrot.slane %v504_v44, 1 }
 0x120   : > { %v518_v50 = vrot.slane %v517_v46, 1 }
 0x121   : > { %v455_v42 = vcombine.low %v439_v38, %v452_v39  ;;  %v506_v51 = vadd.f32 %v505_v48, %v504_v44 }
 0x122   : > { %v519_v53 = vadd.f32 %v518_v50, %v517_v46 }
 0x123   : > { %v462_v45 = vrot.slane %v455_v42, %v461_v40 }
 0x124   : > { %v522_v54 = vcombine.low %v506_v51, %v519_v53 }
 0x125   : > { %v469_v49 = vrot.slane %v462_v45, %v461_v40 }
 0x126   : > { %v529_v55 = vrot.slane %v522_v54, %v461_v40 }
 0x127   : > { %v471_v52 = vadd.f32 %v469_v49, %v426_v47 }
 0x128   : > { %v536_v57 = vrot.slane %v529_v55, %v461_v40 }
 0x129   : > { %476 = vst.msk [vmem:[%s853_s3] sm:$0x3] %vm474_vm1, %v471_v52 }
 0x12a   : > { %v538_v58 = vadd.f32 %v536_v57, %v477_v56 }
 0x12c   : > { %539 = vst.msk [vmem:[%s854_s4] sm:$0x3] %vm474_vm1, %v538_v58 }
 0x12d PF: > { %s15_s15 = sadd.s32 1, %s705_s15  }
 0x12e   : > { %p12_p5 = scmp.ge.s32.totalorder %s15_s15, 4  }
 0x130   :  { %14 = sbr.rel (!%p12_p5) target bundleno = 1 (0x1), region = 78 }

// kernel: basic_block_forward.6
= control target key start
LH: loop header
LB: loop body
LE: loop exit
PB: predicated region body
PF: predicated region fallthrough
CT: control target
= control target key end

     0   :  { %s611_s15 = smov 0   ;;  %s684_s0 = inlined_call_operand.vmem [shape: bf16[128,128], index: 0, kind: input, shape index: {}]   ;;  %s685_s1 = inlined_call_operand.vmem [shape: bf16[128,128], index: 1, kind: input, shape index: {}]   ;;  %s686_s2 = inlined_call_operand.vmem [shape: f32[128,128], index: 2, kind: output, shape index: {0}]   ;;  %s687_s3 = inlined_call_operand.vmem [shape: f32[1,128], index: 3, kind: output, shape index: {1}]   ;;  %s688_s4 = inlined_call_operand.vmem [shape: f32[1,128], index: 4, kind: output, shape index: {2}]  }
   0x1 LB: > { %s480_s16 = sadd.s32 4294967295, %s583_s15   ;;  %p484_p0 = scmp.ge.s32.totalorder %s583_s15, 1  ;;  %s583_s15 = sphi %s611_s15, %s15_s15  }
   0x2   : > { %p158_p1 = scmp.lt.s32.totalorder %s583_s15, 3 }
   0x4   : > { %p159_p2 = pnand %p484_p0, %p158_p1 }
   0x5   : > { %v565_v0 = vld [vmem:[%s685_s1] sm:$0xff] (!%p159_p2)   ;;  %s485_s19 = sshll.u32 (!%p159_p2), %s480_s16, 3  ;;  %v566_v1 = vld [vmem:[%s685_s1 + $0x8] sm:$0xff] (!%p159_p2)   ;;  %v567_v2 = vld [vmem:[%s685_s1 + $0x10] sm:$0xff] (!%p159_p2)   ;;  %p501_p4 = scmp.ne.s32.totalorder (!%p159_p2), %s480_s16, 0 }
   0x6   : > { %162 = sbr.rel (%p159_p2) target bundleno = 285 (0x11d), region = 28  ;;  %p185_p3 = scmp.lt.s32.totalorder (!%p159_p2), %s485_s19, 15  ;;  %516 = vmatprep.subr.bf16.mxu0 (!%p159_p2), %v565_v0  ;;  %540 = vmatprep.subr.bf16.mxu1 (!%p159_p2), %v565_v0  ;;  %v568_v3 = vld [vmem:[%s685_s1 + $0x18] sm:$0xff] (!%p159_p2)   ;;  %v569_v6 = vld [vmem:[%s685_s1 + $0x20] sm:$0xff] (!%p159_p2)   ;;  %v570_v7 = vld [vmem:[%s685_s1 + $0x28] sm:$0xff] (!%p159_p2)  }
   0x7   : > { %517 = vmatpush3.bf16.msra.mxu0 (!%p159_p2), %v565_v0  ;;  %548 = vmatpush3.bf16.msra.mxu1 (!%p159_p2), %v565_v0  ;;  %v571_v8 = vld [vmem:[%s685_s1 + $0x30] sm:$0xff] (!%p159_p2)   ;;  %v572_v9 = vld [vmem:[%s685_s1 + $0x38] sm:$0xff] (!%p159_p2)  }
   0x8   : > { %518 = vmatprep.subr.bf16.mxu0 (!%p159_p2), %v566_v1  ;;  %541 = vmatprep.subr.bf16.mxu1 (!%p159_p2), %v566_v1 }
   0xb   : > { %519 = vmatpush3.bf16.msra.mxu0 (!%p159_p2), %v566_v1  ;;  %549 = vmatpush3.bf16.msra.mxu1 (!%p159_p2), %v566_v1 }
   0xc   : > { %520 = vmatprep.subr.bf16.mxu0 (!%p159_p2), %v567_v2  ;;  %542 = vmatprep.subr.bf16.mxu1 (!%p159_p2), %v567_v2 }
   0xd   : > { %s690_s19 = smov (!%p185_p3, %s485_s19), 15  ;;  %v585_v20 = vmov (!%p501_p4), 0.0  }
   0xe   : > { %s486_s24 = sshll.u32 %s690_s19, 2  ;;  %s488_s12 = sshll.u32 %s690_s19, 3  ;;  %370 = vst [vmem:[%s687_s3] sm:$0x1] (!%p501_p4), %v585_v20  ;;  %371 = vst [vmem:[%s688_s4] sm:$0x1] (!%p501_p4), %v585_v20 }
   0xf   : > { %s636_s27 = scalar_lea.vmem %s684_s0, %s486_s24  ;;  %521 = vmatpush3.bf16.msra.mxu0 %v567_v2  ;;  %550 = vmatpush3.bf16.msra.mxu1 %v567_v2  ;;  %s194_s17 = scalar_lea.vmem %s686_s2, %s488_s12 }
  0x10   : > { %v573_v4 = vld [vmem:[%s636_s27] sm:$0xff]   ;;  %v574_v5 = vld [vmem:[%s636_s27 + $0x10] sm:$0xff]   ;;  %522 = vmatprep.subr.bf16.mxu0 %v568_v3  ;;  %543 = vmatprep.subr.bf16.mxu1 %v568_v3  ;;  %v575_v10 = vld [vmem:[%s636_s27 + $0x8] sm:$0xff]  }
  0x11   : > { %532 = vmatprep.mubr.bf16.mxu0 %v573_v4  ;;  %536 = vmatprep.mubr.bf16.mxu1 %v574_v5  ;;  %v576_v11 = vld [vmem:[%s636_s27 + $0x18] sm:$0xff]  }
  0x13   : > { %523 = vmatpush3.bf16.msra.mxu0 %v568_v3  ;;  %551 = vmatpush3.bf16.msra.mxu1 %v568_v3 }
  0x14   : > { %524 = vmatprep.subr.bf16.mxu0 %v569_v6  ;;  %544 = vmatprep.subr.bf16.mxu1 %v569_v6 }
  0x17   : > { %525 = vmatpush3.bf16.msra.mxu0 %v569_v6  ;;  %552 = vmatpush3.bf16.msra.mxu1 %v569_v6 }
  0x18   : > { %526 = vmatprep.subr.bf16.mxu0 %v570_v7  ;;  %545 = vmatprep.subr.bf16.mxu1 %v570_v7 }
  0x1b   : > { %527 = vmatpush3.bf16.msra.mxu0 %v570_v7  ;;  %553 = vmatpush3.bf16.msra.mxu1 %v570_v7 }
  0x1c   : > { %528 = vmatprep.subr.bf16.mxu0 %v571_v8  ;;  %546 = vmatprep.subr.bf16.mxu1 %v571_v8 }
  0x1f   : > { %529 = vmatpush3.bf16.msra.mxu0 %v571_v8  ;;  %554 = vmatpush3.bf16.msra.mxu1 %v571_v8 }
  0x20   : > { %530 = vmatprep.subr.bf16.mxu0 %v572_v9  ;;  %547 = vmatprep.subr.bf16.mxu1 %v572_v9 }
  0x23   : > { %531 = vmatpush3.bf16.msra.mxu0 %v572_v9  ;;  %555 = vmatpush3.bf16.msra.mxu1 %v572_v9 }
  0x26   : > { %533 = vmatmul.mubr.bf16.vlgmr.msra.gmra.mrb[0].mxu0 %v575_v10  ;;  %537 = vmatmul.mubr.bf16.vlgmr.msra.gmra.mrb[0].mxu1 %v576_v11 }
  0xf7   : > { %369 = sbr.rel (%p501_p4) target bundleno = 254 (0xfe), region = 32 }
  0xf9   : > { %v534_v12 = vpop.f32.mrb[0].mxu0  ;;  %v538_v13 = vpop.f32.mrb[0].mxu1 }
  0xfa   : > { %360 = vst [vmem:[%s194_s17 + $0x10] sm:$0xff] %v534_v12  ;;  %364 = vst [vmem:[%s194_s17 + $0x30] sm:$0xff] %v538_v13  ;;  %v327_v14 = vpop.f32.mrb[1].mxu0  ;;  %v343_v15 = vpop.f32.mrb[1].mxu1 }
  0xfb   : > { %358 = vst [vmem:[%s194_s17] sm:$0xff] %v327_v14  ;;  %362 = vst [vmem:[%s194_s17 + $0x20] sm:$0xff] %v343_v15  ;;  %v535_v16 = vpop.f32.mrb[2].mxu0  ;;  %v539_v17 = vpop.f32.mrb[2].mxu1 }
  0xfc   : > { %361 = vst [vmem:[%s194_s17 + $0x18] sm:$0xff] %v535_v16  ;;  %365 = vst [vmem:[%s194_s17 + $0x38] sm:$0xff] %v539_v17  ;;  %v330_v18 = vpop.f32.mrb[3].mxu0  ;;  %v346_v19 = vpop.f32.mrb[3].mxu1 }
  0xfd   : > { %359 = vst [vmem:[%s194_s17 + $0x8] sm:$0xff] %v330_v18  ;;  %363 = vst [vmem:[%s194_s17 + $0x28] sm:$0xff] %v346_v19 }
  0xfe PF: > { %v373_v21 = vadd.f32 %v330_v18, %v327_v14  ;;  %v389_v22 = vmul.f32 %v327_v14, %v327_v14  ;;  %v390_v23 = vmul.f32 %v330_v18, %v330_v18  ;;  %v391_v24 = vmul.f32 %v534_v12, %v534_v12  ;;  %v372_v52 = vld [vmem:[%s687_s3] sm:$0x1] }
  0xff   : > { %v392_v26 = vmul.f32 %v535_v16, %v535_v16  ;;  %v393_v29 = vmul.f32 %v343_v15, %v343_v15  ;;  %v394_v32 = vmul.f32 %v346_v19, %v346_v19  ;;  %v395_v35 = vmul.f32 %v538_v13, %v538_v13  ;;  %v388_v55 = vld [vmem:[%s688_s4] sm:$0x1] }
 0x100   : > { %v374_v25 = vadd.f32 %v534_v12, %v373_v21  ;;  %v397_v27 = vadd.f32 %v390_v23, %v389_v22  ;;  %v396_v38 = vmul.f32 %v539_v17, %v539_v17 }
 0x102   : > { %v375_v28 = vadd.f32 %v535_v16, %v374_v25  ;;  %v398_v30 = vadd.f32 %v397_v27, %v391_v24 }
 0x104   : > { %v376_v31 = vadd.f32 %v375_v28, %v343_v15  ;;  %v399_v33 = vadd.f32 %v398_v30, %v392_v26 }
 0x106   : > { %v377_v34 = vadd.f32 %v376_v31, %v346_v19  ;;  %v400_v36 = vadd.f32 %v399_v33, %v393_v29 }
 0x108   : > { %v378_v37 = vadd.f32 %v538_v13, %v377_v34  ;;  %v401_v39 = vadd.f32 %v400_v36, %v394_v32 }
 0x10a   : > { %v379_v40 = vadd.f32 %v539_v17, %v378_v37  ;;  %v402_v41 = vadd.f32 %v401_v39, %v395_v35 }
 0x10c   : > { %v380_v42 = vrot.slane %v379_v40, 4  ;;  %v403_v43 = vadd.f32 %v402_v41, %v396_v38 }
 0x10e   : > { %v381_v44 = vadd.f32 %v380_v42, %v379_v40  ;;  %v404_v45 = vrot.slane %v403_v43, 4 }
 0x110   : > { %v382_v46 = vrot.slane %v381_v44, 2  ;;  %v405_v47 = vadd.f32 %v404_v45, %v403_v43 }
 0x112   : > { %v383_v48 = vadd.f32 %v382_v46, %v381_v44  ;;  %v406_v49 = vrot.slane %v405_v47, 2 }
 0x114   : > { %v384_v50 = vrot.slane %v383_v48, 1  ;;  %v407_v51 = vadd.f32 %v406_v49, %v405_v47 }
 0x116   : > { %v385_v53 = vadd.f32 %v384_v50, %v383_v48  ;;  %v408_v54 = vrot.slane %v407_v51, 1 }
 0x118   : > { %v386_v56 = vadd.f32 %v385_v53, %v372_v52  ;;  %v409_v57 = vadd.f32 %v408_v54, %v407_v51 }
 0x11a   : > { %387 = vst [vmem:[%s687_s3] sm:$0x1] %v386_v56  ;;  %v410_v58 = vadd.f32 %v409_v57, %v388_v55 }
 0x11c   : > { %411 = vst [vmem:[%s688_s4] sm:$0x1] %v410_v58 }
 0x11d PF: > { %s15_s15 = sadd.s32 1, %s583_s15  }
 0x11e   : > { %p12_p5 = scmp.ge.s32.totalorder %s15_s15, 4  }
 0x120   :  { %14 = sbr.rel (!%p12_p5) target bundleno = 1 (0x1), region = 78 }

// kernel: basic_block_forward.7
= control target key start
LH: loop header
LB: loop body
LE: loop exit
PB: predicated region body
PF: predicated region fallthrough
CT: control target
= control target key end

     0   :  { %s493_s21 = smov 0   ;;  %s530_s0 = inlined_call_operand.vmem [shape: f32[128,128], index: 0, kind: input, shape index: {}]   ;;  %s531_s1 = inlined_call_operand.vmem [shape: f32[1,128], index: 1, kind: input, shape index: {}]   ;;  %s532_s2 = inlined_call_operand.vmem [shape: f32[1,128], index: 2, kind: input, shape index: {}]   ;;  %s533_s3 = inlined_call_operand.vmem [shape: f32[1,128], index: 3, kind: input, shape index: {}]   ;;  %s534_s4 = inlined_call_operand.vmem [shape: f32[1,128], index: 4, kind: input, shape index: {}]   ;;  %s535_s5 = inlined_call_operand.vmem [shape: f32[128,128], index: 5, kind: input, shape index: {}]   ;;  %s536_s6 = inlined_call_operand.vmem [shape: f32[128,128], index: 6, kind: output, shape index: {}]  }
   0x1 LB: > { %s427_s22 = sadd.s32 4294967295, %s456_s21   ;;  %p431_p0 = scmp.ge.s32.totalorder %s456_s21, 1  ;;  %s456_s21 = sphi %s493_s21, %s16_s21  }
   0x2   : > { %p224_p1 = scmp.lt.s32.totalorder %s456_s21, 3 }
   0x4   : > { %p225_p2 = pnand %p431_p0, %p224_p1 }
   0x5   : > { %v277_v0 = vld [vmem:[%s531_s1] sm:$0x1] (!%p225_p2)  ;;  %s432_s27 = sshll.u32 (!%p225_p2), %s427_s22, 3  ;;  %v300_v8 = vlaneseq (!%p225_p2) }
   0x6   : > { %228 = sbr.rel (%p225_p2) target bundleno = 45 (0x2d), region = 44  ;;  %v279_v1 = vld [vmem:[%s532_s2] sm:$0x1] (!%p225_p2)  ;;  %v278_v2 = vmul.f32 (!%p225_p2), 0.0078125, %v277_v0  ;;  %p260_p3 = scmp.lt.s32.totalorder (!%p225_p2), %s432_s27, 15 }
   0x7   : > { %v280_v3 = vmul.f32 (!%p225_p2), 0.0078125, %v279_v1  ;;  %v301_v9 = vshrl.u32 (!%p225_p2), %v300_v8, 7  ;;  %v286_v10 = vld [vmem:[%s533_s3] sm:$0x1] (!%p225_p2) }
   0x8   : > { %v281_v4 = vmul.f32 (!%p225_p2), %v278_v2, %v278_v2  ;;  %v288_v14 = vld [vmem:[%s534_s4] sm:$0x1] (!%p225_p2) }
   0x9   : > { %v302_v11 = vsub.s32 (!%p225_p2), 0, %v301_v9 }
   0xa   : > { %v282_v5 = vsub.f32 (!%p225_p2), %v280_v3, %v281_v4 }
   0xc   : > { %v283_v6 = vmax.f32 (!%p225_p2), %v282_v5, 0.0 }
   0xd   : > { %s538_s27 = smov (!%p260_p3, %s432_s27), 15 }
   0xe   : > { %v284_v7 = vadd.f32 1e-05, %v283_v6  ;;  %s507_s28 = sshll.u32 %s538_s27, 3 }
   0xf   : > { %s263_s7 = scalar_lea.vmem %s530_s0, %s507_s28  ;;  %s269_s14 = scalar_lea.vmem %s535_s5, %s507_s28 }
  0x10   : > { %448 = vrsqrt.f32 %v284_v7  ;;  %v291_v15 = vld [vmem:[%s263_s7] sm:$0xff]  ;;  %v292_v16 = vld [vmem:[%s263_s7 + $0x8] sm:$0xff]  ;;  %v293_v17 = vld [vmem:[%s263_s7 + $0x10] sm:$0xff]  ;;  %s275_s17 = scalar_lea.vmem %s536_s6, %s507_s28 }
  0x11   : > { %v294_v18 = vld [vmem:[%s263_s7 + $0x18] sm:$0xff]  ;;  %v295_v21 = vld [vmem:[%s263_s7 + $0x20] sm:$0xff]  ;;  %v296_v22 = vld [vmem:[%s263_s7 + $0x28] sm:$0xff] }
  0x12   : > { %v297_v23 = vld [vmem:[%s263_s7 + $0x30] sm:$0xff]  ;;  %v298_v24 = vld [vmem:[%s263_s7 + $0x38] sm:$0xff]  ;;  %v327_v34 = vld [vmem:[%s269_s14] sm:$0xff] }
  0x13   : > { %v328_v35 = vld [vmem:[%s269_s14 + $0x8] sm:$0xff]  ;;  %v329_v37 = vld [vmem:[%s269_s14 + $0x10] sm:$0xff]  ;;  %v330_v38 = vld [vmem:[%s269_s14 + $0x18] sm:$0xff] }
  0x14   : > { %v331_v39 = vld [vmem:[%s269_s14 + $0x20] sm:$0xff]  ;;  %v332_v44 = vld [vmem:[%s269_s14 + $0x28] sm:$0xff]  ;;  %v333_v45 = vld [vmem:[%s269_s14 + $0x30] sm:$0xff] }
  0x15   : > { %v334_v46 = vld [vmem:[%s269_s14 + $0x38] sm:$0xff] }
  0x1a   : > { %v449_v12 = vpop.eup %448 }
  0x1b   : > { %v287_v13 = vmul.f32 %v449_v12, %v286_v10 }
  0x1d   : > { %v289_v19 = vmul.f32 %v287_v13, %v278_v2  ;;  %v303_v20 = vrot.slane %v287_v13, %v302_v11 }
  0x1f   : > { %v290_v25 = vsub.f32 %v288_v14, %v289_v19  ;;  %v305_v26 = vmul.f32 %v303_v20, %v291_v15  ;;  %v306_v27 = vmul.f32 %v303_v20, %v292_v16  ;;  %v307_v28 = vmul.f32 %v303_v20, %v293_v17 }
  0x20   : > { %v308_v29 = vmul.f32 %v303_v20, %v294_v18  ;;  %v309_v30 = vmul.f32 %v303_v20, %v295_v21  ;;  %v310_v31 = vmul.f32 %v303_v20, %v296_v22  ;;  %v311_v32 = vmul.f32 %v303_v20, %v297_v23 }
  0x21   : > { %v317_v33 = vrot.slane %v290_v25, %v302_v11  ;;  %v312_v36 = vmul.f32 %v303_v20, %v298_v24 }
  0x23   : > { %v319_v40 = vadd.f32 %v317_v33, %v305_v26  ;;  %v320_v41 = vadd.f32 %v317_v33, %v306_v27  ;;  %v321_v42 = vadd.f32 %v317_v33, %v307_v28  ;;  %v322_v43 = vadd.f32 %v317_v33, %v308_v29 }
  0x24   : > { %v323_v47 = vadd.f32 %v317_v33, %v309_v30  ;;  %v324_v48 = vadd.f32 %v317_v33, %v310_v31  ;;  %v325_v49 = vadd.f32 %v317_v33, %v311_v32  ;;  %v326_v50 = vadd.f32 %v317_v33, %v312_v36 }
  0x25   : > { %v335_v51 = vadd.f32 %v327_v34, %v319_v40  ;;  %v336_v52 = vadd.f32 %v328_v35, %v320_v41  ;;  %v337_v53 = vadd.f32 %v329_v37, %v321_v42  ;;  %v338_v54 = vadd.f32 %v330_v38, %v322_v43 }
  0x26   : > { %v339_v55 = vadd.f32 %v331_v39, %v323_v47  ;;  %v340_v56 = vadd.f32 %v332_v44, %v324_v48  ;;  %v341_v57 = vadd.f32 %v333_v45, %v325_v49  ;;  %v342_v58 = vadd.f32 %v334_v46, %v326_v50 }
  0x27   : > { %v343_v59 = vmax.f32 %v335_v51, 0.0  ;;  %v344_v60 = vmax.f32 %v336_v52, 0.0  ;;  %v345_v61 = vmax.f32 %v337_v53, 0.0  ;;  %v346_v62 = vmax.f32 %v338_v54, 0.0 }
  0x28   : > { %v347_v63 = vmax.f32 %v339_v55, 0.0  ;;  %v348_v0 = vmax.f32 %v340_v56, 0.0  ;;  %v349_v1 = vmax.f32 %v341_v57, 0.0  ;;  %v350_v2 = vmax.f32 %v342_v58, 0.0 }
  0x29   : > { %351 = vst [vmem:[%s275_s17] sm:$0xff] %v343_v59  ;;  %352 = vst [vmem:[%s275_s17 + $0x8] sm:$0xff] %v344_v60 }
  0x2a   : > { %353 = vst [vmem:[%s275_s17 + $0x10] sm:$0xff] %v345_v61  ;;  %354 = vst [vmem:[%s275_s17 + $0x18] sm:$0xff] %v346_v62 }
  0x2b   : > { %355 = vst [vmem:[%s275_s17 + $0x20] sm:$0xff] %v347_v63  ;;  %356 = vst [vmem:[%s275_s17 + $0x28] sm:$0xff] %v348_v0 }
  0x2c   : > { %357 = vst [vmem:[%s275_s17 + $0x30] sm:$0xff] %v349_v1  ;;  %358 = vst [vmem:[%s275_s17 + $0x38] sm:$0xff] %v350_v2 }
  0x2d PF: > { %s16_s21 = sadd.s32 1, %s456_s21  }
  0x2e   : > { %p13_p4 = scmp.ge.s32.totalorder %s16_s21, 4  }
  0x30   :  { %15 = sbr.rel (!%p13_p4) target bundleno = 1 (0x1), region = 77 }

</bundles_post_ra>
